<compile_context>
chip_gen: v5e
topology: v5e:2x2
jax: 0.10.0
libtpu: 0.0.40
codegen_flags: <defaults>
</compile_context>

<pallas_src>
import jax
import jax.numpy as jnp
from jax.experimental import pallas as pl
from jax.experimental.pallas import tpu as pltpu

LATENT_DIMS = 2
IN_FEATURES = 784   # 1 * 28 * 28
HIDDEN = 512
OUT_PADDED = 128    # lane-dense padded output width


def _round_up(x, m):
    return ((x + m - 1) // m) * m


def encoder_kernel(x_ref, w1_ref, b1_ref, w2_ref, b2_ref, o_ref):
    # x_ref : (TB, 784)   f32   (batch tile, streamed; cast to bf16 here)
    # w1_ref: (784, 512)  bf16  (resident across grid steps)
    # b1_ref: (1, 512)    f32
    # w2_ref: (512, 128)  bf16  (columns >= latent_dims are zero)
    # b2_ref: (1, 128)    f32   (entries >= latent_dims are zero)
    # o_ref : (TB, 128)   bf16  (lane-dense; sliced to latent_dims outside)
    x = x_ref[...].astype(jnp.bfloat16)
    h = jnp.dot(x, w1_ref[...], preferred_element_type=jnp.float32)
    h = jnp.maximum(h + b1_ref[...], 0.0)                      # bias + ReLU in f32
    z = jnp.dot(h.astype(jnp.bfloat16), w2_ref[...],
                preferred_element_type=jnp.float32)
    o_ref[...] = (z + b2_ref[...]).astype(o_ref.dtype)


def encoder_forward(x_nchw, w1, b1, w2, b2, *, block_b=1024):
    """Forward pass matching the PyTorch Encoder.

    x_nchw: (B, C, H, W) with C*H*W == 784, float32
    w1: (784, 512), b1: (512,), w2: (512, latent_dims), b2: (latent_dims,)
    returns: (B, latent_dims) float32
    """
    B = x_nchw.shape[0]
    x_flat = x_nchw.reshape(B, -1).astype(jnp.float32)  # torch.flatten(x, 1)
    assert x_flat.shape[1] == IN_FEATURES

    # Batch tile: multiple of 16 sublanes (bf16-friendly), capped by block_b.
    tb = min(block_b, _round_up(B, 16))
    n_steps = pl.cdiv(B, tb)
    if n_steps > 1 and n_steps % 2 == 1:
        # Make the grid length even so v7x's two TensorCores stay balanced.
        tb = _round_up(pl.cdiv(B, n_steps + 1), 16)
        n_steps = pl.cdiv(B, tb)
    grid = (n_steps,)

    # Resident bf16 MXU weights (small, one-time casts).
    w1_b = w1.astype(jnp.bfloat16)                       # (784, 512)
    b1_b = b1.reshape(1, HIDDEN).astype(jnp.float32)     # (1, 512)

    w2_p = jnp.zeros((HIDDEN, OUT_PADDED), jnp.bfloat16)
    w2_p = w2_p.at[:, :LATENT_DIMS].set(w2.astype(jnp.bfloat16))
    b2_p = jnp.zeros((1, OUT_PADDED), jnp.float32)
    b2_p = b2_p.at[0, :LATENT_DIMS].set(b2.astype(jnp.float32))

    cost = pl.CostEstimate(
        flops=2 * B * IN_FEATURES * HIDDEN + 2 * B * HIDDEN * LATENT_DIMS,
        transcendentals=0,
        bytes_accessed=(B * IN_FEATURES * 4            # x read (f32)
                        + IN_FEATURES * HIDDEN * 2     # w1 (bf16)
                        + HIDDEN * OUT_PADDED * 2      # w2 (bf16)
                        + HIDDEN * 4 + OUT_PADDED * 4  # biases (f32)
                        + B * OUT_PADDED * 2),         # output write (bf16)
    )

    out_padded = pl.pallas_call(
        encoder_kernel,
        out_shape=jax.ShapeDtypeStruct((B, OUT_PADDED), jnp.bfloat16),
        grid=grid,
        in_specs=[
            pl.BlockSpec((tb, IN_FEATURES), lambda i: (i, 0)),     # x tiles (streamed)
            pl.BlockSpec((IN_FEATURES, HIDDEN), lambda i: (0, 0)),  # w1 resident
            pl.BlockSpec((1, HIDDEN), lambda i: (0, 0)),            # b1 resident
            pl.BlockSpec((HIDDEN, OUT_PADDED), lambda i: (0, 0)),   # w2 resident
            pl.BlockSpec((1, OUT_PADDED), lambda i: (0, 0)),        # b2 resident
        ],
        out_specs=pl.BlockSpec((tb, OUT_PADDED), lambda i: (i, 0)),
        compiler_params=pltpu.CompilerParams(
            dimension_semantics=("parallel",),        # batch tiles across TCs (v7x)
            vmem_limit_bytes=48 * 1024 * 1024,        # room for the 1024-row f32 tile
        ),
        cost_estimate=cost,
    )(x_flat, w1_b, b1_b, w2_p, b2_p)

    # Strip the lane padding of the 2-wide latent output; cast back to f32.
    return out_padded[:, :LATENT_DIMS].astype(jnp.float32)


def init_params(key):
    """Deterministic init mimicking nn.Linear's uniform(-1/sqrt(fan_in), 1/sqrt(fan_in))."""
    k1, k2, k3, k4 = jax.random.split(key, 4)
    bound1 = 1.0 / jnp.sqrt(IN_FEATURES)
    bound2 = 1.0 / jnp.sqrt(HIDDEN)
    w1 = jax.random.uniform(k1, (IN_FEATURES, HIDDEN), jnp.float32, -bound1, bound1)
    b1 = jax.random.uniform(k2, (HIDDEN,), jnp.float32, -bound1, bound1)
    w2 = jax.random.uniform(k3, (HIDDEN, LATENT_DIMS), jnp.float32, -bound2, bound2)
    b2 = jax.random.uniform(k4, (LATENT_DIMS,), jnp.float32, -bound2, bound2)
    return w1, b1, w2, b2


if __name__ == "__main__":
    key = jax.random.PRNGKey(0)
    kx, kp = jax.random.split(key)

    # Small MNIST-like batch: (B, C, H, W) = (2, 1, 28, 28) -> flattens to 784.
    x = jax.random.normal(kx, (2, 1, 28, 28), dtype=jnp.float32)
    w1, b1, w2, b2 = init_params(kp)

    out = encoder_forward(x, w1, b1, w2, b2)
    out = jax.block_until_ready(out)

    # References for correctness.
    x_flat = x.reshape(x.shape[0], -1)

    # (a) bf16-emulated reference (matches the kernel's MXU/output dtypes).
    xb = x_flat.astype(jnp.bfloat16).astype(jnp.float32)
    w1b = w1.astype(jnp.bfloat16).astype(jnp.float32)
    w2b = w2.astype(jnp.bfloat16).astype(jnp.float32)
    hb = jnp.maximum(xb @ w1b + b1, 0.0)
    ref_bf16 = hb.astype(jnp.bfloat16).astype(jnp.float32) @ w2b + b2
    ref_bf16 = ref_bf16.astype(jnp.bfloat16).astype(jnp.float32)  # output rounding

    # (b) pure f32 reference (loose tolerance due to bf16 MXU operands/output).
    ref_f32 = jnp.maximum(x_flat @ w1 + b1, 0.0) @ w2 + b2

    assert out.shape == (2, LATENT_DIMS)
    assert jnp.allclose(out, ref_bf16, atol=2e-2, rtol=2e-2), "mismatch vs bf16 reference"
    assert jnp.allclose(out, ref_f32, atol=5e-2, rtol=5e-2), "mismatch vs f32 reference"

    print("KERNEL_OK")
</pallas_src>

<mosaic_0001>
module attributes {stable_mosaic.version = 11 : i64} {
  func.func @encoder_kernel(%arg0: i32, %arg1: memref<16x784xf32, #tpu.memory_space<vmem>>, %arg2: memref<784x512xbf16, #tpu.memory_space<vmem>>, %arg3: memref<1x512xf32, #tpu.memory_space<vmem>>, %arg4: memref<512x128xbf16, #tpu.memory_space<vmem>>, %arg5: memref<1x128xf32, #tpu.memory_space<vmem>>, %arg6: memref<16x128xbf16, #tpu.memory_space<vmem>>) attributes {dimension_semantics = [#tpu.dimension_semantics<parallel>], iteration_bounds = array<i64: 1>, scalar_prefetch = 0 : i64, scratch_operands = 0 : i64, tpu.core_type = #tpu.core_type<tc>, window_params = [{transform_indices = @transform_0, window_bounds = array<i64: 16, 784>}, {pipeline_mode = #tpu.pipeline_mode<synchronous>, transform_indices = @transform_1, window_bounds = array<i64: 784, 512>}, {pipeline_mode = #tpu.pipeline_mode<synchronous>, transform_indices = @transform_2, window_bounds = array<i64: 1, 512>}, {pipeline_mode = #tpu.pipeline_mode<synchronous>, transform_indices = @transform_3, window_bounds = array<i64: 512, 128>}, {pipeline_mode = #tpu.pipeline_mode<synchronous>, transform_indices = @transform_4, window_bounds = array<i64: 1, 128>}, {transform_indices = @transform_5, window_bounds = array<i64: 16, 128>}]} {
    %c0 = arith.constant 0 : index
    %c0_0 = arith.constant 0 : index
    %0 = vector.load %arg1[%c0, %c0_0] : memref<16x784xf32, #tpu.memory_space<vmem>>, vector<16x784xf32>
    %1 = arith.truncf %0 : vector<16x784xf32> to vector<16x784xbf16>
    %c0_1 = arith.constant 0 : index
    %c0_2 = arith.constant 0 : index
    %2 = vector.load %arg2[%c0_1, %c0_2] : memref<784x512xbf16, #tpu.memory_space<vmem>>, vector<784x512xbf16>
    %cst = arith.constant dense<0.000000e+00> : vector<16x512xf32>
    %3 = tpu.matmul %1, %2, %cst {dimension_numbers = #tpu.dot_dimension_numbers<[1], [0], [0], [1], [0, 0, 1, 1], [], []>} : vector<16x784xbf16>, vector<784x512xbf16>, vector<16x512xf32> -> vector<16x512xf32>
    %c0_3 = arith.constant 0 : index
    %c0_4 = arith.constant 0 : index
    %4 = vector.load %arg3[%c0_3, %c0_4] : memref<1x512xf32, #tpu.memory_space<vmem>>, vector<1x512xf32>
    %5 = vector.broadcast %4 : vector<1x512xf32> to vector<16x512xf32>
    %6 = arith.addf %3, %5 : vector<16x512xf32>
    %cst_5 = arith.constant 0.000000e+00 : f32
    %7 = vector.broadcast %cst_5 : f32 to vector<16x512xf32>
    %8 = arith.maximumf %6, %7 : vector<16x512xf32>
    %9 = arith.truncf %8 : vector<16x512xf32> to vector<16x512xbf16>
    %c0_6 = arith.constant 0 : index
    %c0_7 = arith.constant 0 : index
    %10 = vector.load %arg4[%c0_6, %c0_7] : memref<512x128xbf16, #tpu.memory_space<vmem>>, vector<512x128xbf16>
    %cst_8 = arith.constant dense<0.000000e+00> : vector<16x128xf32>
    %11 = tpu.matmul %9, %10, %cst_8 {dimension_numbers = #tpu.dot_dimension_numbers<[1], [0], [0], [1], [0, 0, 1, 1], [], []>} : vector<16x512xbf16>, vector<512x128xbf16>, vector<16x128xf32> -> vector<16x128xf32>
    %c0_9 = arith.constant 0 : index
    %c0_10 = arith.constant 0 : index
    %12 = vector.load %arg5[%c0_9, %c0_10] : memref<1x128xf32, #tpu.memory_space<vmem>>, vector<1x128xf32>
    %13 = vector.broadcast %12 : vector<1x128xf32> to vector<16x128xf32>
    %14 = arith.addf %11, %13 : vector<16x128xf32>
    %15 = arith.truncf %14 : vector<16x128xf32> to vector<16x128xbf16>
    %c0_11 = arith.constant 0 : index
    %c0_12 = arith.constant 0 : index
    %16 = vector.load %arg6[%c0_11, %c0_12] : memref<16x128xbf16, #tpu.memory_space<vmem>>, vector<16x128xbf16>
    tpu.vector_store %arg6[%c0_11, %c0_12], %15 {strides = array<i32>} : memref<16x128xbf16, #tpu.memory_space<vmem>>, vector<16x128xbf16>,
    return
  }
  func.func @transform_0(%arg0: i32) -> (i32, i32) {
    %c0_i32 = arith.constant 0 : i32
    %c0_i32_0 = arith.constant 0 : i32
    return %arg0, %c0_i32 : i32, i32
  }
  func.func @transform_1(%arg0: i32) -> (i32, i32) {
    %c0_i32 = arith.constant 0 : i32
    %c0_i32_0 = arith.constant 0 : i32
    %c0_i32_1 = arith.constant 0 : i32
    return %c0_i32, %c0_i32_0 : i32, i32
  }
  func.func @transform_2(%arg0: i32) -> (i32, i32) {
    %c0_i32 = arith.constant 0 : i32
    %c0_i32_0 = arith.constant 0 : i32
    %c0_i32_1 = arith.constant 0 : i32
    return %c0_i32, %c0_i32_0 : i32, i32
  }
  func.func @transform_3(%arg0: i32) -> (i32, i32) {
    %c0_i32 = arith.constant 0 : i32
    %c0_i32_0 = arith.constant 0 : i32
    %c0_i32_1 = arith.constant 0 : i32
    return %c0_i32, %c0_i32_0 : i32, i32
  }
  func.func @transform_4(%arg0: i32) -> (i32, i32) {
    %c0_i32 = arith.constant 0 : i32
    %c0_i32_0 = arith.constant 0 : i32
    %c0_i32_1 = arith.constant 0 : i32
    return %c0_i32, %c0_i32_0 : i32, i32
  }
  func.func @transform_5(%arg0: i32) -> (i32, i32) {
    %c0_i32 = arith.constant 0 : i32
    %c0_i32_0 = arith.constant 0 : i32
    return %arg0, %c0_i32 : i32, i32
  }
}

</mosaic_0001>

<bundles_post_ra>
// kernel: tpu_custom_call.1
= control target key start
LH: loop header
LB: loop body
LE: loop exit
PB: predicated region body
PF: predicated region fallthrough
CT: control target
= control target key end

     0   :  { %10 = vsyncpa [#allocation3], 0  ;;  %s3568_s0 = inlined_call_operand.hbm [shape: f32[2,784], index: 0, kind: input, shape index: {}]   ;;  %s3569_s1 = inlined_call_operand.hbm [shape: bf16[784,512], index: 1, kind: input, shape index: {}]   ;;  %s3570_s2 = inlined_call_operand.hbm [shape: f32[1,512], index: 2, kind: input, shape index: {}]   ;;  %s3571_s3 = inlined_call_operand.hbm [shape: bf16[512,128], index: 3, kind: input, shape index: {}]   ;;  %s3572_s4 = inlined_call_operand.vmem [shape: f32[1,128], index: 4, kind: input, shape index: {}]   ;;  %s3573_s5 = inlined_call_operand.hbm [shape: bf16[2,128], index: 5, kind: output, shape index: {}]  }
   0x1   :  { %11 = vsyncpa [#allocation6], 0 }
   0x2   :  { %12 = vsyncpa [#allocation9], 0 }
   0x3   :  { %13 = vsyncpa [#allocation4], 0  ;;  %s31_s20 = sshll.u32 %s3569_s1, 4  ;;  %s32_s20 = int_to_ptr.hbm [resolvable:$true] %s31_s20 }
   0x4   :  { %17 = vsyncadd [#allocation3], 1568  ;;  %s3439_s21 = smov [#allocation5]   ;;  %s18_s25 = sshll.u32 %s3568_s0, 4  ;;  %s19_s25 = int_to_ptr.hbm [resolvable:$true] %s18_s25 }
   0x5   :  { %s33_s22 = sshll.u32 %s3439_s21, 4  ;;  %s3440_s26 = smov 256   ;;  %s34_s22 = int_to_ptr.vmem [resolvable:$true] %s33_s22 }
   0x6   :  { %s3441_s27 = smov 16   ;;  %s3442_s28 = smov [#allocation2]  }
   0x7   :  { %39 = dma.hbm_to_vmem [thread:$0]  %s32_s20, 25088, %s34_s22, [#allocation6], %s3440_s26, %s3440_s26, %s3441_s27  }
   0x8   :  { %s20_s29 = sshll.u32 %s3442_s28, 4  ;;  %s3443_s30 = smov 224   ;;  %s21_s29 = int_to_ptr.vmem [resolvable:$true] %s20_s29 }
   0x9   :  { %s3444_s6 = smov 14   ;;  %s45_s8 = sshll.u32 %s3570_s2, 4  ;;  %s46_s8 = int_to_ptr.hbm [resolvable:$true] %s45_s8 }
   0xa   :  { %26 = dma.hbm_to_vmem [thread:$0]  %s19_s25, 224, %s21_s29, [#allocation3], %s3443_s30, %s3443_s30, %s3444_s6  }
   0xb   :  { %s3445_s9 = smov [#allocation7]   ;;  %s55_s12 = sshll.u32 %s3571_s3, 4  ;;  %s56_s12 = int_to_ptr.hbm [resolvable:$true] %s55_s12 }
   0xc   :  { %s47_s10 = sshll.u32 %s3445_s9, 4  ;;  %s3446_s13 = smov [#allocation8]   ;;  %s48_s10 = int_to_ptr.vmem [resolvable:$true] %s47_s10 }
   0xd   :  { %50 = dma.hbm_to_vmem [thread:$0]  %s46_s8, 64, %s48_s10, [#allocation6]  }
   0xe   :  { %s57_s14 = sshll.u32 %s3446_s13, 4  ;;  %s3447_s15 = smov 64   ;;  %s58_s14 = int_to_ptr.vmem [resolvable:$true] %s57_s14 }
   0xf   :  { %s3448_s16 = smov 4  }
  0x10   :  { %63 = dma.hbm_to_vmem [thread:$0]  %s56_s12, 4096, %s58_s14, [#allocation9], %s3447_s15, %s3447_s15, %s3448_s16  }
  0x11   :  { %3431 = dma.done.wait [#allocation3], 1792  }
  0x12   :  { %3432 = vsyncadd [#allocation3], 4294965504 }
  0x13   :  { %3433 = dma.done.wait [#allocation6], 25152  }
  0x14   :  { %3434 = vsyncadd [#allocation6], 4294942144 }
  0x15   :  { %3435 = dma.done.wait [#allocation9], 4096  }
  0x16   :  { %3436 = vsyncadd [#allocation9], 4294963200  ;;  %v2268_v0 = vld [vmem:[#allocation5 + $0xe0] sm:$0xf]  ;;  %v3100_v1 = vld [vmem:[#allocation5 + $0xec] sm:$0xf0] }
  0x17   :  { %v2396_v2 = vld [vmem:[#allocation5 + $0x1e0] sm:$0xf]  ;;  %v2269_v3 = vor.u32 %v3100_v1, %v2268_v0  ;;  %v3132_v4 = vld [vmem:[#allocation5 + $0x1ec] sm:$0xf0]  ;;  %vm1359_vm0 = vcmask 130048   ;;  %vm2089_vm1 = vcmask 1040384  }
  0x18   :  { %v2524_v5 = vld [vmem:[#allocation5 + $0x2e0] sm:$0xf]  ;;  %v3164_v6 = vld [vmem:[#allocation5 + $0x2ec] sm:$0xf0]  ;;  %v2397_v7 = vor.u32 %v3132_v4, %v2396_v2  ;;  %vm2093_vm2 = vcmask 1041409   ;;  %vm2097_vm3 = vcmask 1042434  }
  0x19   :  { %v2525_v8 = vor.u32 %v3164_v6, %v2524_v5  ;;  %v2652_v9 = vld [vmem:[#allocation5 + $0x3e0] sm:$0xf]  ;;  %v3196_v10 = vld [vmem:[#allocation5 + $0x3ec] sm:$0xf0]  ;;  %1363 = vmatpush.bf16.msra.mxu0 %v2269_v3  ;;  %vm2101_vm4 = vcmask 1043459  }
  0x1a   :  { %v2252_v11 = vld [vmem:[#allocation5 + $0xc0] sm:$0xf]  ;;  %v2653_v12 = vor.u32 %v3196_v10, %v2652_v9  ;;  %v3096_v13 = vld [vmem:[#allocation5 + $0xcc] sm:$0xf0]  ;;  %1377 = vmatpush.bf16.msra.mxu1 %v2397_v7 }
  0x1b   :  { %v2380_v14 = vld [vmem:[#allocation5 + $0x1c0] sm:$0xf]  ;;  %v3128_v15 = vld [vmem:[#allocation5 + $0x1cc] sm:$0xf0]  ;;  %1391 = vmatpush.bf16.msra.mxu2 %v2525_v8  ;;  %v2253_v16 = vor.u32 %v3096_v13, %v2252_v11 }
  0x1c   :  { %v2381_v17 = vor.u32 %v3128_v15, %v2380_v14  ;;  %v2508_v18 = vld [vmem:[#allocation5 + $0x2c0] sm:$0xf]  ;;  %v3160_v19 = vld [vmem:[#allocation5 + $0x2cc] sm:$0xf0]  ;;  %1405 = vmatpush.bf16.msra.mxu3 %v2653_v12 }
  0x1d   :  { %v2636_v20 = vld [vmem:[#allocation5 + $0x3c0] sm:$0xf]  ;;  %v2509_v21 = vor.u32 %v3160_v19, %v2508_v18  ;;  %v3192_v22 = vld [vmem:[#allocation5 + $0x3cc] sm:$0xf0]  ;;  %1364 = vmatpush.bf16.msra.mxu0 %v2253_v16 }
  0x1e   :  { %v2236_v23 = vld [vmem:[#allocation5 + $0xa0] sm:$0xf]  ;;  %v3092_v24 = vld [vmem:[#allocation5 + $0xac] sm:$0xf0]  ;;  %v2637_v25 = vor.u32 %v3192_v22, %v2636_v20  ;;  %1378 = vmatpush.bf16.msra.mxu1 %v2381_v17 }
  0x1f   :  { %v2364_v26 = vld [vmem:[#allocation5 + $0x1a0] sm:$0xf]  ;;  %v3124_v27 = vld [vmem:[#allocation5 + $0x1ac] sm:$0xf0]  ;;  %v2237_v29 = vor.u32 %v3092_v24, %v2236_v23  ;;  %1392 = vmatpush.bf16.msra.mxu2 %v2509_v21 }
  0x20   :  { %v2492_v28 = vld [vmem:[#allocation5 + $0x2a0] sm:$0xf]  ;;  %v3156_v30 = vld [vmem:[#allocation5 + $0x2ac] sm:$0xf0]  ;;  %v2365_v33 = vor.u32 %v3124_v27, %v2364_v26  ;;  %1406 = vmatpush.bf16.msra.mxu3 %v2637_v25 }
  0x21   :  { %v2620_v31 = vld [vmem:[#allocation5 + $0x3a0] sm:$0xf]  ;;  %v3188_v32 = vld [vmem:[#allocation5 + $0x3ac] sm:$0xf0]  ;;  %v2493_v34 = vor.u32 %v3156_v30, %v2492_v28  ;;  %1365 = vmatpush.bf16.msra.mxu0 %v2237_v29 }
  0x22   :  { %v2220_v35 = vld [vmem:[#allocation5 + $0x80] sm:$0xf]  ;;  %v3088_v36 = vld [vmem:[#allocation5 + $0x8c] sm:$0xf0]  ;;  %v2621_v38 = vor.u32 %v3188_v32, %v2620_v31  ;;  %1379 = vmatpush.bf16.msra.mxu1 %v2365_v33 }
  0x23   :  { %v2348_v37 = vld [vmem:[#allocation5 + $0x180] sm:$0xf]  ;;  %v3120_v39 = vld [vmem:[#allocation5 + $0x18c] sm:$0xf0]  ;;  %v2221_v44 = vor.u32 %v3088_v36, %v2220_v35  ;;  %1393 = vmatpush.bf16.msra.mxu2 %v2493_v34 }
  0x24   :  { %v2476_v40 = vld [vmem:[#allocation5 + $0x280] sm:$0xf]  ;;  %v3152_v41 = vld [vmem:[#allocation5 + $0x28c] sm:$0xf0]  ;;  %v2349_v45 = vor.u32 %v3120_v39, %v2348_v37  ;;  %1407 = vmatpush.bf16.msra.mxu3 %v2621_v38  ;;  %v3098_v37 = vld [vmem:[#allocation5 + $0xe4] sm:$0xf] }
  0x25   :  { %v2604_v42 = vld [vmem:[#allocation5 + $0x380] sm:$0xf]  ;;  %v3184_v43 = vld [vmem:[#allocation5 + $0x38c] sm:$0xf0]  ;;  %v2477_v46 = vor.u32 %v3152_v41, %v2476_v40  ;;  %1366 = vmatpush.bf16.msra.mxu0 %v2221_v44  ;;  %v2270_v38 = vld [vmem:[#allocation5 + $0xf0] sm:$0xf0] }
  0x26   :  { %v2204_v47 = vld [vmem:[#allocation5 + $0x60] sm:$0xf]  ;;  %v3084_v48 = vld [vmem:[#allocation5 + $0x6c] sm:$0xf0]  ;;  %v2605_v50 = vor.u32 %v3184_v43, %v2604_v42  ;;  %1380 = vmatpush.bf16.msra.mxu1 %v2349_v45 }
  0x27   :  { %v2332_v49 = vld [vmem:[#allocation5 + $0x160] sm:$0xf]  ;;  %v3116_v51 = vld [vmem:[#allocation5 + $0x16c] sm:$0xf0]  ;;  %v2205_v56 = vor.u32 %v3084_v48, %v2204_v47  ;;  %1394 = vmatpush.bf16.msra.mxu2 %v2477_v46  ;;  %v2273_v46 = vor.u32 %v3098_v37, %v2270_v38 }
  0x28   :  { %v2460_v52 = vld [vmem:[#allocation5 + $0x260] sm:$0xf]  ;;  %v3148_v53 = vld [vmem:[#allocation5 + $0x26c] sm:$0xf0]  ;;  %v2333_v57 = vor.u32 %v3116_v51, %v2332_v49  ;;  %1408 = vmatpush.bf16.msra.mxu3 %v2605_v50  ;;  %v91_v50 = vld [vmem:[#allocation2 + $0x38] sm:$0xff] }
  0x29   :  { %v2588_v54 = vld [vmem:[#allocation5 + $0x360] sm:$0xf]  ;;  %v3180_v55 = vld [vmem:[#allocation5 + $0x36c] sm:$0xf0]  ;;  %v2461_v58 = vor.u32 %v3148_v53, %v2460_v52  ;;  %1367 = vmatpush.bf16.msra.mxu0 %v2205_v56  ;;  %v3094_v53 = vld [vmem:[#allocation5 + $0xc4] sm:$0xf] }
  0x2a   :  { %v2188_v59 = vld [vmem:[#allocation5 + $0x40] sm:$0xf]  ;;  %v3080_v60 = vld [vmem:[#allocation5 + $0x4c] sm:$0xf0]  ;;  %v2589_v62 = vor.u32 %v3180_v55, %v2588_v54  ;;  %1381 = vmatpush.bf16.msra.mxu1 %v2333_v57  ;;  %v2254_v54 = vld [vmem:[#allocation5 + $0xd0] sm:$0xf0] }
  0x2b   :  { %v2316_v61 = vld [vmem:[#allocation5 + $0x140] sm:$0xf]  ;;  %v3112_v63 = vld [vmem:[#allocation5 + $0x14c] sm:$0xf0]  ;;  %v2189_v4 = vor.u32 %v3080_v60, %v2188_v59  ;;  %1395 = vmatpush.bf16.msra.mxu2 %v2461_v58  ;;  %v93_v55 = vld [vmem:[#allocation2 + $0x46] sm:$0xff] }
  0x2c   :  { %v2444_v0 = vld [vmem:[#allocation5 + $0x240] sm:$0xf]  ;;  %v3144_v1 = vld [vmem:[#allocation5 + $0x24c] sm:$0xf0]  ;;  %v2317_v6 = vor.u32 %v3112_v63, %v2316_v61  ;;  %1409 = vmatpush.bf16.msra.mxu3 %v2589_v62  ;;  %v95_v58 = vld [vmem:[#allocation2 + $0x54] sm:$0xff] }
  0x2d   :  { %v2572_v2 = vld [vmem:[#allocation5 + $0x340] sm:$0xf]  ;;  %v3176_v3 = vld [vmem:[#allocation5 + $0x34c] sm:$0xf0]  ;;  %v2445_v7 = vor.u32 %v3144_v1, %v2444_v0  ;;  %1368 = vmatpush.bf16.msra.mxu0 %v2189_v4  ;;  %v3090_v62 = vld [vmem:[#allocation5 + $0xa4] sm:$0xf] }
  0x2e   :  { %v2172_v5 = vld [vmem:[#allocation5 + $0x20] sm:$0xf]  ;;  %v3076_v8 = vld [vmem:[#allocation5 + $0x2c] sm:$0xf0]  ;;  %v2573_v11 = vor.u32 %v3176_v3, %v2572_v2  ;;  %1382 = vmatpush.bf16.msra.mxu1 %v2317_v6  ;;  %v2238_v63 = vld [vmem:[#allocation5 + $0xb0] sm:$0xf0]  ;;  %v2257_v3 = vor.u32 %v3094_v53, %v2254_v54 }
  0x2f   :  { %v2300_v9 = vld [vmem:[#allocation5 + $0x120] sm:$0xf]  ;;  %v3108_v10 = vld [vmem:[#allocation5 + $0x12c] sm:$0xf0]  ;;  %v2173_v18 = vor.u32 %v3076_v8, %v2172_v5  ;;  %1396 = vmatpush.bf16.msra.mxu2 %v2445_v7 }
  0x30   :  { %v2428_v12 = vld [vmem:[#allocation5 + $0x220] sm:$0xf]  ;;  %v3140_v13 = vld [vmem:[#allocation5 + $0x22c] sm:$0xf0]  ;;  %v2301_v25 = vor.u32 %v3108_v10, %v2300_v9  ;;  %1410 = vmatpush.bf16.msra.mxu3 %v2573_v11  ;;  %v2241_v11 = vor.u32 %v3090_v62, %v2238_v63  ;;  %v2174_v62 = vld [vmem:[#allocation5 + $0x30] sm:$0xf0] }
  0x31   :  { %v2556_v14 = vld [vmem:[#allocation5 + $0x320] sm:$0xf]  ;;  %v3172_v15 = vld [vmem:[#allocation5 + $0x32c] sm:$0xf0]  ;;  %v2429_v26 = vor.u32 %v3140_v13, %v2428_v12  ;;  %1369 = vmatpush.bf16.msra.mxu0 %v2173_v18 }
  0x32   :  { %v2156_v16 = vld [vmem:[#allocation5] sm:$0xf]  ;;  %v3072_v17 = vld [vmem:[#allocation5 + $0xc] sm:$0xf0]  ;;  %v2557_v31 = vor.u32 %v3172_v15, %v2556_v14  ;;  %1383 = vmatpush.bf16.msra.mxu1 %v2301_v25  ;;  %v3086_v14 = vld [vmem:[#allocation5 + $0x84] sm:$0xf] }
  0x33   :  { %v2284_v19 = vld [vmem:[#allocation5 + $0x100] sm:$0xf]  ;;  %v3104_v20 = vld [vmem:[#allocation5 + $0x10c] sm:$0xf0]  ;;  %v2157_v36 = vor.u32 %v3072_v17, %v2156_v16  ;;  %1397 = vmatpush.bf16.msra.mxu2 %v2429_v26  ;;  %v2222_v15 = vld [vmem:[#allocation5 + $0x90] sm:$0xf0] }
  0x34   :  { %v2412_v21 = vld [vmem:[#allocation5 + $0x200] sm:$0xf]  ;;  %v3136_v22 = vld [vmem:[#allocation5 + $0x20c] sm:$0xf0]  ;;  %v2285_v39 = vor.u32 %v3104_v20, %v2284_v19  ;;  %1411 = vmatpush.bf16.msra.mxu3 %v2557_v31  ;;  %v2225_v18 = vor.u32 %v3086_v14, %v2222_v15  ;;  %v3130_v19 = vld [vmem:[#allocation5 + $0x1e4] sm:$0xf] }
  0x35   :  { %v83_v23 = vld [vmem:[#allocation2] sm:$0xff]  ;;  %v85_v24 = vld [vmem:[#allocation2 + $0xe] sm:$0xff]  ;;  %v2413_v40 = vor.u32 %v3136_v22, %v2412_v21  ;;  %1370 = vmatpush.bf16.msra.mxu0 %v2157_v36 }
  0x36   :  { %v2540_v27 = vld [vmem:[#allocation5 + $0x300] sm:$0xf]  ;;  %v3168_v28 = vld [vmem:[#allocation5 + $0x30c] sm:$0xf0]  ;;  %115 = vst [vmem:[#allocation1] ss:$4 sm:$0xff] %v83_v23  ;;  %1384 = vmatpush.bf16.msra.mxu1 %v2285_v39 }
  0x37   :  { %v87_v29 = vld [vmem:[#allocation2 + $0x1c] sm:$0xff]  ;;  %v89_v30 = vld [vmem:[#allocation2 + $0x2a] sm:$0xff]  ;;  %117 = vst [vmem:[#allocation1 + $0x1] ss:$4 sm:$0xff] %v85_v24  ;;  %v2541_v43 = vor.u32 %v3168_v28, %v2540_v27  ;;  %1398 = vmatpush.bf16.msra.mxu2 %v2413_v40  ;;  %v2398_v20 = vld [vmem:[#allocation5 + $0x1f0] sm:$0xf0] }
  0x38   :  { %v2780_v32 = vld [vmem:[#allocation5 + $0x4e0] sm:$0xf]  ;;  %v3228_v33 = vld [vmem:[#allocation5 + $0x4ec] sm:$0xf0]  ;;  %119 = vst [vmem:[#allocation1 + $0x2] ss:$4 sm:$0xff] %v87_v29 }
  0x39   :  { %v2908_v34 = vld [vmem:[#allocation5 + $0x5e0] sm:$0xf]  ;;  %v3260_v35 = vld [vmem:[#allocation5 + $0x5ec] sm:$0xf0]  ;;  %121 = vst [vmem:[#allocation1 + $0x3] ss:$4 sm:$0xff] %v89_v30  ;;  %v2781_v44 = vor.u32 %v3228_v33, %v2780_v32  ;;  %1412 = vmatpush.bf16.msra.mxu3 %v2541_v43  ;;  %v2401_v30 = vor.u32 %v3130_v19, %v2398_v20 }
  0x3a   :  { %v2924_v41 = vld [vmem:[#allocation5 + $0x600] sm:$0xf]  ;;  %v3264_v42 = vld [vmem:[#allocation5 + $0x60c] sm:$0xf0]  ;;  %v2909_v45 = vor.u32 %v3260_v35, %v2908_v34  ;;  %v3126_v24 = vld [vmem:[#allocation5 + $0x1c4] sm:$0xf] }
  0x3b   :  { %v2764_v47 = vld [vmem:[#allocation5 + $0x4c0] sm:$0xf]  ;;  %v3224_v48 = vld [vmem:[#allocation5 + $0x4cc] sm:$0xf0]  ;;  %v2925_v51 = vor.u32 %v3264_v42, %v2924_v41  ;;  %1419 = vmatpush.bf16.msrb.mxu0 %v2781_v44  ;;  %v2382_v25 = vld [vmem:[#allocation5 + $0x1d0] sm:$0xf0] }
  0x3c   :  { %v2892_v49 = vld [vmem:[#allocation5 + $0x5c0] sm:$0xf]  ;;  %v3256_v52 = vld [vmem:[#allocation5 + $0x5cc] sm:$0xf0]  ;;  %v2765_v59 = vor.u32 %v3224_v48, %v2764_v47  ;;  %1433 = vmatpush.bf16.msrb.mxu1 %v2909_v45  ;;  %v3082_v27 = vld [vmem:[#allocation5 + $0x64] sm:$0xf] }
  0x3d   :  { %v2748_v56 = vld [vmem:[#allocation5 + $0x4a0] sm:$0xf]  ;;  %v3220_v57 = vld [vmem:[#allocation5 + $0x4ac] sm:$0xf0]  ;;  %1461 = vmatpush.bf16.msrb.mxu3 %v2273_v46  ;;  %v2893_v2 = vor.u32 %v3256_v52, %v2892_v49  ;;  %1454 = vmatpush.bf16.msrb.mxu2 %v2925_v51  ;;  %v2206_v28 = vld [vmem:[#allocation5 + $0x70] sm:$0xf0]  ;;  %v2385_v51 = vor.u32 %v3126_v24, %v2382_v25 }
  0x3e   :  { %v2876_v60 = vld [vmem:[#allocation5 + $0x5a0] sm:$0xf]  ;;  %v3252_v61 = vld [vmem:[#allocation5 + $0x5ac] sm:$0xf0]  ;;  %v2749_v7 = vor.u32 %v3220_v57, %v2748_v56  ;;  %v2209_v43 = vor.u32 %v3082_v27, %v2206_v28  ;;  %v84_v45 = vld [vmem:[#allocation2 + $0x8] sm:$0x3f] }
  0x3f   :  { %v97_v6 = vld [vmem:[#allocation2 + $0x62] sm:$0xff]  ;;  %1420 = vmatpush.bf16.msrb.mxu0 %v2765_v59  ;;  %v2732_v8 = vld [vmem:[#allocation5 + $0x480] sm:$0xf]  ;;  %v2877_v10 = vor.u32 %v3252_v61, %v2876_v60  ;;  %v86_v46 = vld [vmem:[#allocation2 + $0x16] sm:$0x3f] }
  0x40   :  { %v130_v0 = vld.sshfl [vmem:[#allocation1] sm:$0xff pattern:$0x73625140]  ;;  %v131_v1 = vld.sshfl [vmem:[#allocation1 + $0x8] sm:$0xff pattern:$0x73625140]  ;;  %1434 = vmatpush.bf16.msrb.mxu1 %v2893_v2 }
  0x41   :  { %v132_v4 = vld.sshfl [vmem:[#allocation1 + $0x10] sm:$0xff pattern:$0x73625140]  ;;  %v133_v5 = vld.sshfl [vmem:[#allocation1 + $0x18] sm:$0xff pattern:$0x73625140]  ;;  %1462 = vmatpush.bf16.msrb.mxu3 %v2257_v3 }
  0x42   :  { %137 = vst [vmem:[#allocation1] ss:$4 sm:$0xff] %v91_v50  ;;  %v3216_v9 = vld [vmem:[#allocation5 + $0x48c] sm:$0xf0]  ;;  %v2860_v12 = vld [vmem:[#allocation5 + $0x580] sm:$0xf] }
  0x43   :  { %138 = vst [vmem:[#allocation1 + $0x1] ss:$4 sm:$0xff] %v93_v55  ;;  %v3248_v13 = vld [vmem:[#allocation5 + $0x58c] sm:$0xf0]  ;;  %1421 = vmatpush.bf16.msrb.mxu0 %v2749_v7  ;;  %v2733_v16 = vor.u32 %v3216_v9, %v2732_v8  ;;  %v2716_v21 = vld [vmem:[#allocation5 + $0x460] sm:$0xf] }
  0x44   :  { %139 = vst [vmem:[#allocation1 + $0x2] ss:$4 sm:$0xff] %v95_v58  ;;  %1435 = vmatpush.bf16.msrb.mxu1 %v2877_v10  ;;  %v2861_v17 = vor.u32 %v3248_v13, %v2860_v12  ;;  %v3212_v22 = vld [vmem:[#allocation5 + $0x46c] sm:$0xf0]  ;;  %v2844_v23 = vld [vmem:[#allocation5 + $0x560] sm:$0xf] }
  0x45   :  { %140 = vst [vmem:[#allocation1 + $0x3] ss:$4 sm:$0xff] %v97_v6  ;;  %1463 = vmatpush.bf16.msrb.mxu3 %v2241_v11  ;;  %v3244_v26 = vld [vmem:[#allocation5 + $0x56c] sm:$0xf0]  ;;  %v2700_v32 = vld [vmem:[#allocation5 + $0x440] sm:$0xf]  ;;  %v2717_v38 = vor.u32 %v3212_v22, %v2716_v21 }
  0x46   :  { %v3208_v33 = vld [vmem:[#allocation5 + $0x44c] sm:$0xf0]  ;;  %v2828_v39 = vld [vmem:[#allocation5 + $0x540] sm:$0xf]  ;;  %v2845_v42 = vor.u32 %v3244_v26, %v2844_v23  ;;  %v3122_v47 = vld [vmem:[#allocation5 + $0x1a4] sm:$0xf] }
  0x47   :  { %1422 = vmatpush.bf16.msrb.mxu0 %v2733_v16  ;;  %v3240_v44 = vld [vmem:[#allocation5 + $0x54c] sm:$0xf0]  ;;  %v3078_v48 = vld [vmem:[#allocation5 + $0x44] sm:$0xf]  ;;  %v2190_v49 = vld [vmem:[#allocation5 + $0x50] sm:$0xf0]  ;;  %v2701_v54 = vor.u32 %v3208_v33, %v2700_v32 }
  0x48   :  { %1436 = vmatpush.bf16.msrb.mxu1 %v2861_v17  ;;  %v88_v50 = vld [vmem:[#allocation2 + $0x24] sm:$0x3f]  ;;  %v90_v53 = vld [vmem:[#allocation2 + $0x32] sm:$0x3f]  ;;  %123 = vst [vmem:[#allocation1 + $0x20] ss:$4 sm:$0xff] %v84_v45  ;;  %v2829_v57 = vor.u32 %v3240_v44, %v2828_v39  ;;  %v2193_v58 = vor.u32 %v3078_v48, %v2190_v49 }
  0x49   :  { %1464 = vmatpush.bf16.msrb.mxu3 %v2225_v18  ;;  %v2366_v52 = vld [vmem:[#allocation5 + $0x1b0] sm:$0xf0]  ;;  %v2684_v55 = vld [vmem:[#allocation5 + $0x420] sm:$0xf]  ;;  %v3204_v56 = vld [vmem:[#allocation5 + $0x42c] sm:$0xf0] }
  0x4a   :  { %125 = vst [vmem:[#allocation1 + $0x21] ss:$4 sm:$0xff] %v86_v46  ;;  %v2812_v59 = vld [vmem:[#allocation5 + $0x520] sm:$0xf]  ;;  %v3236_v60 = vld [vmem:[#allocation5 + $0x52c] sm:$0xf0]  ;;  %v2369_v63 = vor.u32 %v3122_v47, %v2366_v52  ;;  %v2685_v2 = vor.u32 %v3204_v56, %v2684_v55 }
  0x4b   :  { %1423 = vmatpush.bf16.msrb.mxu0 %v2717_v38  ;;  %127 = vst [vmem:[#allocation1 + $0x22] ss:$4 sm:$0xff] %v88_v50  ;;  %v3074_v61 = vld [vmem:[#allocation5 + $0x24] sm:$0xf]  ;;  %v2668_v3 = vld [vmem:[#allocation5 + $0x400] sm:$0xf] }
  0x4c   :  { %v147_v29 = vld.sshfl [vmem:[#allocation1 + $0x10] sm:$0xff pattern:$0x73625140]  ;;  %v145_v31 = vld.sshfl [vmem:[#allocation1] sm:$0xff pattern:$0x73625140]  ;;  %1437 = vmatpush.bf16.msrb.mxu1 %v2845_v42 }
  0x4d   :  { %v3494_v34 = vpack.c.bf16 %v147_v29, %v132_v4  ;;  %v3496_v35 = vpack.c.bf16 %v145_v31, %v130_v0  ;;  %v148_v36 = vld.sshfl [vmem:[#allocation1 + $0x18] sm:$0xff pattern:$0x73625140]  ;;  %v146_v37 = vld.sshfl [vmem:[#allocation1 + $0x8] sm:$0xff pattern:$0x73625140]  ;;  %1465 = vmatpush.bf16.msrb.mxu3 %v2209_v43  ;;  %v2813_v4 = vor.u32 %v3236_v60, %v2812_v59 }
  0x4e   :  { %v3498_v40 = vpack.c.bf16 %v148_v36, %v133_v5  ;;  %v3500_v41 = vpack.c.bf16 %v146_v37, %v131_v1  ;;  %129 = vst [vmem:[#allocation1 + $0x23] ss:$4 sm:$0xff] %v90_v53  ;;  %v3118_v0 = vld [vmem:[#allocation5 + $0x184] sm:$0xf]  ;;  %v2350_v1 = vld [vmem:[#allocation5 + $0x190] sm:$0xf0]  ;;  %v2177_v5 = vor.u32 %v3074_v61, %v2174_v62 }
  0x4f   :  { %1399 = vmatmul.bf16.vlgmr.msra.gmra.mxu2 %v3494_v34  ;;  %1371 = vmatmul.bf16.vlgmr.msra.gmra.mxu0 %v3496_v35  ;;  %v3200_v6 = vld [vmem:[#allocation5 + $0x40c] sm:$0xf0]  ;;  %v2796_v7 = vld [vmem:[#allocation5 + $0x500] sm:$0xf]  ;;  %v3114_v9 = vld [vmem:[#allocation5 + $0x164] sm:$0xf]  ;;  %v2353_v15 = vor.u32 %v3118_v0, %v2350_v1 }
  0x50   :  { %1475 = vmatpush.bf16.msra.mxu2 %v2401_v30  ;;  %1413 = vmatmul.bf16.vlgmr.msra.gmra.mxu3 %v3498_v40  ;;  %v3232_v8 = vld [vmem:[#allocation5 + $0x50c] sm:$0xf0]  ;;  %v2334_v10 = vld [vmem:[#allocation5 + $0x170] sm:$0xf0]  ;;  %v3070_v12 = vld [vmem:[#allocation5 + $0x4] sm:$0xf]  ;;  %v2669_v21 = vor.u32 %v3200_v6, %v2668_v3 }
  0x51   :  { %1385 = vmatmul.bf16.vlgmr.msra.gmra.mxu1 %v3500_v41  ;;  %1424 = vmatpush.bf16.msrb.mxu0 %v2701_v54  ;;  %v92_v11 = vld [vmem:[#allocation2 + $0x40] sm:$0x3f]  ;;  %v3162_v14 = vld [vmem:[#allocation5 + $0x2e4] sm:$0xf]  ;;  %v94_v16 = vld [vmem:[#allocation2 + $0x4e] sm:$0x3f]  ;;  %v2797_v27 = vor.u32 %v3232_v8, %v2796_v7  ;;  %v2337_v38 = vor.u32 %v3114_v9, %v2334_v10 }
  0x52   :  { %1438 = vmatpush.bf16.msrb.mxu1 %v2829_v57  ;;  %1466 = vmatpush.bf16.msrb.mxu3 %v2193_v58  ;;  %v2158_v13 = vld [vmem:[#allocation5 + $0x10] sm:$0xf0]  ;;  %v3194_v18 = vld [vmem:[#allocation5 + $0x3e4] sm:$0xf]  ;;  %v96_v20 = vld [vmem:[#allocation2 + $0x5c] sm:$0x3f] }
  0x53   :  { %v2526_v17 = vld [vmem:[#allocation5 + $0x2f0] sm:$0xf0]  ;;  %v3226_v22 = vld [vmem:[#allocation5 + $0x4e4] sm:$0xf]  ;;  %v98_v24 = vld [vmem:[#allocation2 + $0x6a] sm:$0x3f]  ;;  %v2161_v28 = vor.u32 %v3070_v12, %v2158_v13 }
  0x54   :  { %1476 = vmatpush.bf16.msra.mxu2 %v2385_v51  ;;  %v2654_v19 = vld [vmem:[#allocation5 + $0x3f0] sm:$0xf0]  ;;  %v3158_v29 = vld [vmem:[#allocation5 + $0x2c4] sm:$0xf]  ;;  %v2529_v33 = vor.u32 %v3162_v14, %v2526_v17 }
  0x55   :  { %1425 = vmatpush.bf16.msrb.mxu0 %v2685_v2  ;;  %v2782_v23 = vld [vmem:[#allocation5 + $0x4f0] sm:$0xf0]  ;;  %v3506_v25 = vld.sshfl [vmem:[#allocation1 + $0x20] sm:$0xff pattern:$0x73625140]  ;;  %v2657_v36 = vor.u32 %v3194_v18, %v2654_v19 }
  0x56   :  { %1439 = vmatpush.bf16.msrb.mxu1 %v2813_v4  ;;  %v3508_v26 = vld.sshfl [vmem:[#allocation1 + $0x28] sm:$0xff pattern:$0x73625140]  ;;  %1467 = vmatpush.bf16.msrb.mxu3 %v2177_v5  ;;  %v3110_v30 = vld [vmem:[#allocation5 + $0x144] sm:$0xf]  ;;  %v2785_v39 = vor.u32 %v3226_v22, %v2782_v23 }
  0x57   :  { %v2318_v31 = vld [vmem:[#allocation5 + $0x150] sm:$0xf0]  ;;  %v136_v32 = vld.sshfl [vmem:[#allocation1 + $0x30] sm:$0xff pattern:$0x73625140] }
  0x58   :  { %1477 = vmatpush.bf16.msra.mxu2 %v2369_v63  ;;  %v2510_v37 = vld [vmem:[#allocation5 + $0x2d0] sm:$0xf0]  ;;  %141 = vst [vmem:[#allocation1 + $0x20] ss:$4 sm:$0xff] %v92_v11  ;;  %v3190_v42 = vld [vmem:[#allocation5 + $0x3c4] sm:$0xf]  ;;  %v2321_v50 = vor.u32 %v3110_v30, %v2318_v31 }
  0x59   :  { %v2638_v43 = vld [vmem:[#allocation5 + $0x3d0] sm:$0xf0]  ;;  %142 = vst [vmem:[#allocation1 + $0x21] ss:$4 sm:$0xff] %v94_v16  ;;  %1426 = vmatpush.bf16.msrb.mxu0 %v2669_v21  ;;  %v3222_v44 = vld [vmem:[#allocation5 + $0x4c4] sm:$0xf]  ;;  %v2513_v47 = vor.u32 %v3158_v29, %v2510_v37 }
  0x5a   :  { %v2766_v45 = vld [vmem:[#allocation5 + $0x4d0] sm:$0xf0]  ;;  %143 = vst [vmem:[#allocation1 + $0x22] ss:$4 sm:$0xff] %v96_v20  ;;  %1440 = vmatpush.bf16.msrb.mxu1 %v2797_v27  ;;  %1468 = vmatpush.bf16.msrb.mxu3 %v2161_v28  ;;  %v3106_v46 = vld [vmem:[#allocation5 + $0x124] sm:$0xf]  ;;  %v2641_v48 = vor.u32 %v3190_v42, %v2638_v43 }
  0x5b   :  { %144 = vst [vmem:[#allocation1 + $0x23] ss:$4 sm:$0xff] %v98_v24  ;;  %v3154_v49 = vld [vmem:[#allocation5 + $0x2a4] sm:$0xf]  ;;  %v2769_v51 = vor.u32 %v3222_v44, %v2766_v45  ;;  %v2494_v52 = vld [vmem:[#allocation5 + $0x2b0] sm:$0xf0] }
  0x5c   :  { %1478 = vmatpush.bf16.msra.mxu2 %v2353_v15  ;;  %v3186_v53 = vld [vmem:[#allocation5 + $0x3a4] sm:$0xf]  ;;  %v2622_v54 = vld [vmem:[#allocation5 + $0x3b0] sm:$0xf0]  ;;  %v2497_v60 = vor.u32 %v3154_v49, %v2494_v52 }
  0x5d   :  { %1489 = vmatpush.bf16.msra.mxu0 %v2529_v33  ;;  %v2302_v55 = vld [vmem:[#allocation5 + $0x130] sm:$0xf0]  ;;  %v3218_v56 = vld [vmem:[#allocation5 + $0x4a4] sm:$0xf]  ;;  %v2625_v61 = vor.u32 %v3186_v53, %v2622_v54 }
  0x5e   :  { %1503 = vmatpush.bf16.msra.mxu1 %v2657_v36  ;;  %1517 = vmatpush.bf16.msra.mxu3 %v2785_v39  ;;  %v2750_v57 = vld [vmem:[#allocation5 + $0x4b0] sm:$0xf0]  ;;  %v3102_v58 = vld [vmem:[#allocation5 + $0x104] sm:$0xf]  ;;  %v2305_v0 = vor.u32 %v3106_v46, %v2302_v55 }
  0x5f   :  { %v2286_v59 = vld [vmem:[#allocation5 + $0x110] sm:$0xf0]  ;;  %v3150_v62 = vld [vmem:[#allocation5 + $0x284] sm:$0xf]  ;;  %v2753_v2 = vor.u32 %v3218_v56, %v2750_v57 }
  0x60   :  { %1479 = vmatpush.bf16.msra.mxu2 %v2337_v38  ;;  %1469 = vmatmul.bf16.vlgmr.msrb.gmra.mxu3 %v3496_v35  ;;  %v2478_v63 = vld [vmem:[#allocation5 + $0x290] sm:$0xf0]  ;;  %v3258_v1 = vld [vmem:[#allocation5 + $0x5e4] sm:$0xf]  ;;  %v2289_v16 = vor.u32 %v3102_v58, %v2286_v59 }
  0x61   :  { %1490 = vmatpush.bf16.msra.mxu0 %v2513_v47  ;;  %v3182_v3 = vld [vmem:[#allocation5 + $0x384] sm:$0xf]  ;;  %v2606_v4 = vld [vmem:[#allocation5 + $0x390] sm:$0xf0]  ;;  %v2481_v10 = vor.u32 %v3150_v62, %v2478_v63 }
  0x62   :  { %1504 = vmatpush.bf16.msra.mxu1 %v2641_v48  ;;  %1518 = vmatpush.bf16.msra.mxu3 %v2769_v51  ;;  %v2910_v5 = vld [vmem:[#allocation5 + $0x5f0] sm:$0xf0]  ;;  %v3214_v6 = vld [vmem:[#allocation5 + $0x484] sm:$0xf]  ;;  %v2609_v14 = vor.u32 %v3182_v3, %v2606_v4 }
  0x63   :  { %v2734_v7 = vld [vmem:[#allocation5 + $0x490] sm:$0xf0]  ;;  %v151_v8 = vld.sshfl [vmem:[#allocation1 + $0x30] sm:$0xff pattern:$0x73625140]  ;;  %v2913_v22 = vor.u32 %v3258_v1, %v2910_v5 }
  0x64   :  { %1480 = vmatpush.bf16.msra.mxu2 %v2321_v50  ;;  %v149_v9 = vld.sshfl [vmem:[#allocation1 + $0x20] sm:$0xff pattern:$0x73625140]  ;;  %v3511_v11 = vpack.c.bf16 %v151_v8, %v136_v32  ;;  %v150_v13 = vld.sshfl [vmem:[#allocation1 + $0x28] sm:$0xff pattern:$0x73625140]  ;;  %v2737_v18 = vor.u32 %v3214_v6, %v2734_v7 }
  0x65   :  { %v3514_v12 = vpack.c.bf16 %v149_v9, %v3506_v25  ;;  %1491 = vmatpush.bf16.msra.mxu0 %v2497_v60  ;;  %v3146_v15 = vld [vmem:[#allocation5 + $0x264] sm:$0xf]  ;;  %v3517_v17 = vpack.c.bf16 %v150_v13, %v3508_v26  ;;  %v2462_v19 = vld [vmem:[#allocation5 + $0x270] sm:$0xf0]  ;;  %v3101_v1 = vld [vmem:[#allocation5 + $0xf4] sm:$0xf0] }
  0x66   :  { %1505 = vmatpush.bf16.msra.mxu1 %v2625_v61  ;;  %1519 = vmatpush.bf16.msra.mxu3 %v2753_v2  ;;  %v3178_v20 = vld [vmem:[#allocation5 + $0x364] sm:$0xf]  ;;  %v2590_v21 = vld [vmem:[#allocation5 + $0x370] sm:$0xf0]  ;;  %v2465_v26 = vor.u32 %v3146_v15, %v2462_v19  ;;  %v2532_v5 = vld [vmem:[#allocation5 + $0x2e8] sm:$0xf] }
  0x67   :  { %2938 = vmatmul.msk.bf16.vlgmr.msrb.gmra.mxu2 %vm1359_vm0, %v3511_v11  ;;  %1427 = vmatmul.bf16.vlgmr.msrb.gmra.mxu0 %v3514_v12  ;;  %v3210_v23 = vld [vmem:[#allocation5 + $0x464] sm:$0xf]  ;;  %v2718_v24 = vld [vmem:[#allocation5 + $0x470] sm:$0xf0]  ;;  %v2593_v28 = vor.u32 %v3178_v20, %v2590_v21  ;;  %v3165_v6 = vld [vmem:[#allocation5 + $0x2f4] sm:$0xf0] }
  0x68   :  { %1481 = vmatpush.bf16.msra.mxu2 %v2305_v0  ;;  %1441 = vmatmul.bf16.vlgmr.msrb.gmra.mxu1 %v3517_v17  ;;  %v3254_v25 = vld [vmem:[#allocation5 + $0x5c4] sm:$0xf]  ;;  %v2894_v27 = vld [vmem:[#allocation5 + $0x5d0] sm:$0xf0]  ;;  %v2721_v30 = vor.u32 %v3210_v23, %v2718_v24  ;;  %v2276_v0 = vld [vmem:[#allocation5 + $0xe8] sm:$0xf]  ;;  %v2533_v19 = vor.u32 %v3165_v6, %v2532_v5 }
  0x69   :  { %1492 = vmatpush.bf16.msra.mxu0 %v2481_v10  ;;  %v3142_v29 = vld [vmem:[#allocation5 + $0x244] sm:$0xf]  ;;  %v2446_v31 = vld [vmem:[#allocation5 + $0x250] sm:$0xf0]  ;;  %v2897_v36 = vor.u32 %v3254_v25, %v2894_v27  ;;  %v2404_v15 = vld [vmem:[#allocation5 + $0x1e8] sm:$0xf] }
  0x6a   :  { %1506 = vmatpush.bf16.msra.mxu1 %v2609_v14  ;;  %1520 = vmatpush.bf16.msra.mxu3 %v2737_v18  ;;  %v3174_v32 = vld [vmem:[#allocation5 + $0x344] sm:$0xf]  ;;  %v2574_v33 = vld [vmem:[#allocation5 + $0x350] sm:$0xf0]  ;;  %v2449_v43 = vor.u32 %v3142_v29, %v2446_v31  ;;  %v2277_v14 = vor.u32 %v3101_v1, %v2276_v0  ;;  %v3133_v18 = vld [vmem:[#allocation5 + $0x1f4] sm:$0xf0] }
  0x6b   :  { %v3206_v37 = vld [vmem:[#allocation5 + $0x444] sm:$0xf]  ;;  %v2702_v38 = vld [vmem:[#allocation5 + $0x450] sm:$0xf0]  ;;  %v2577_v44 = vor.u32 %v3174_v32, %v2574_v33  ;;  %v2260_v20 = vld [vmem:[#allocation5 + $0xc8] sm:$0xf] }
  0x6c   :  { %1482 = vmatpush.bf16.msra.mxu2 %v2289_v16  ;;  %v3250_v39 = vld [vmem:[#allocation5 + $0x5a4] sm:$0xf]  ;;  %v2878_v42 = vld [vmem:[#allocation5 + $0x5b0] sm:$0xf0]  ;;  %v2705_v46 = vor.u32 %v3206_v37, %v2702_v38  ;;  %v3097_v21 = vld [vmem:[#allocation5 + $0xd4] sm:$0xf0] }
  0x6d   :  { %1493 = vmatpush.bf16.msra.mxu0 %v2465_v26  ;;  %v3138_v45 = vld [vmem:[#allocation5 + $0x224] sm:$0xf]  ;;  %v2430_v47 = vld [vmem:[#allocation5 + $0x230] sm:$0xf0]  ;;  %v2881_v50 = vor.u32 %v3250_v39, %v2878_v42  ;;  %v2516_v23 = vld [vmem:[#allocation5 + $0x2c8] sm:$0xf]  ;;  %v2405_v26 = vor.u32 %v3133_v18, %v2404_v15 }
  0x6e   :  { %1507 = vmatpush.bf16.msra.mxu1 %v2593_v28  ;;  %1521 = vmatpush.bf16.msra.mxu3 %v2721_v30  ;;  %v3170_v48 = vld [vmem:[#allocation5 + $0x324] sm:$0xf]  ;;  %v2558_v49 = vld [vmem:[#allocation5 + $0x330] sm:$0xf0]  ;;  %v2433_v55 = vor.u32 %v3138_v45, %v2430_v47  ;;  %v3161_v24 = vld [vmem:[#allocation5 + $0x2d4] sm:$0xf0]  ;;  %v2261_v28 = vor.u32 %v3097_v21, %v2260_v20 }
  0x6f   :  { %v3202_v51 = vld [vmem:[#allocation5 + $0x424] sm:$0xf]  ;;  %v2686_v52 = vld [vmem:[#allocation5 + $0x430] sm:$0xf0]  ;;  %v2561_v56 = vor.u32 %v3170_v48, %v2558_v49  ;;  %v2388_v29 = vld [vmem:[#allocation5 + $0x1c8] sm:$0xf]  ;;  %v2517_v31 = vor.u32 %v3161_v24, %v2516_v23 }
  0x70   :  { %1531 = vmatpush.bf16.msrb.mxu2 %v2913_v22  ;;  %v3246_v53 = vld [vmem:[#allocation5 + $0x584] sm:$0xf]  ;;  %v2862_v54 = vld [vmem:[#allocation5 + $0x590] sm:$0xf0]  ;;  %v2689_v60 = vor.u32 %v3202_v51, %v2686_v52  ;;  %v3129_v30 = vld [vmem:[#allocation5 + $0x1d4] sm:$0xf0] }
  0x71   :  { %1494 = vmatpush.bf16.msra.mxu0 %v2449_v43  ;;  %v3134_v57 = vld [vmem:[#allocation5 + $0x204] sm:$0xf]  ;;  %v2414_v58 = vld [vmem:[#allocation5 + $0x210] sm:$0xf0]  ;;  %v2865_v3 = vor.u32 %v3246_v53, %v2862_v54  ;;  %v2244_v32 = vld [vmem:[#allocation5 + $0xa8] sm:$0xf]  ;;  %v2389_v43 = vor.u32 %v3129_v30, %v2388_v29 }
  0x72   :  { %1508 = vmatpush.bf16.msra.mxu1 %v2577_v44  ;;  %v3166_v59 = vld [vmem:[#allocation5 + $0x304] sm:$0xf]  ;;  %1522 = vmatpush.bf16.msra.mxu3 %v2705_v46  ;;  %v2542_v61 = vld [vmem:[#allocation5 + $0x310] sm:$0xf0]  ;;  %v2417_v9 = vor.u32 %v3134_v57, %v2414_v58  ;;  %v3093_v33 = vld [vmem:[#allocation5 + $0xb4] sm:$0xf0] }
  0x73   :  { %v3198_v62 = vld [vmem:[#allocation5 + $0x404] sm:$0xf]  ;;  %v2670_v63 = vld [vmem:[#allocation5 + $0x410] sm:$0xf0]  ;;  %v2545_v10 = vor.u32 %v3166_v59, %v2542_v61  ;;  %v2500_v37 = vld [vmem:[#allocation5 + $0x2a8] sm:$0xf]  ;;  %v2245_v44 = vor.u32 %v3093_v33, %v2244_v32 }
  0x74   :  { %1532 = vmatpush.bf16.msrb.mxu2 %v2897_v36  ;;  %v3262_v2 = vld [vmem:[#allocation5 + $0x604] sm:$0xf]  ;;  %v2926_v4 = vld [vmem:[#allocation5 + $0x610] sm:$0xf0]  ;;  %v2673_v13 = vor.u32 %v3198_v62, %v2670_v63  ;;  %v3157_v38 = vld [vmem:[#allocation5 + $0x2b4] sm:$0xf0] }
  0x75   :  { %v3242_v7 = vld [vmem:[#allocation5 + $0x564] sm:$0xf]  ;;  %v2846_v8 = vld [vmem:[#allocation5 + $0x570] sm:$0xf0]  ;;  %1495 = vmatpush.bf16.msra.mxu0 %v2433_v55  ;;  %v2929_v16 = vor.u32 %v3262_v2, %v2926_v4  ;;  %v2372_v45 = vld [vmem:[#allocation5 + $0x1a8] sm:$0xf]  ;;  %v2501_v47 = vor.u32 %v3157_v38, %v2500_v37 }
  0x76   :  { %1509 = vmatpush.bf16.msra.mxu1 %v2561_v56  ;;  %1523 = vmatpush.bf16.msra.mxu3 %v2689_v60  ;;  %v2849_v22 = vor.u32 %v3242_v7, %v2846_v8  ;;  %v3238_v25 = vld [vmem:[#allocation5 + $0x544] sm:$0xf]  ;;  %v2830_v27 = vld [vmem:[#allocation5 + $0x550] sm:$0xf0]  ;;  %v3125_v46 = vld [vmem:[#allocation5 + $0x1b4] sm:$0xf0] }
  0x77   :  { %1483 = vmatmul.bf16.vlgmr.msra.gmra.mxu2 %v3500_v41  ;;  %v2833_v36 = vor.u32 %v3238_v25, %v2830_v27  ;;  %v3234_v39 = vld [vmem:[#allocation5 + $0x524] sm:$0xf]  ;;  %v2814_v42 = vld [vmem:[#allocation5 + $0x530] sm:$0xf0]  ;;  %v2228_v48 = vld [vmem:[#allocation5 + $0x88] sm:$0xf]  ;;  %v2373_v57 = vor.u32 %v3125_v46, %v2372_v45 }
  0x78   :  { %1533 = vmatpush.bf16.msrb.mxu2 %v2881_v50  ;;  %v3089_v49 = vld [vmem:[#allocation5 + $0x94] sm:$0xf0]  ;;  %v2817_v50 = vor.u32 %v3234_v39, %v2814_v42  ;;  %v2484_v51 = vld [vmem:[#allocation5 + $0x288] sm:$0xf]  ;;  %v3230_v53 = vld [vmem:[#allocation5 + $0x504] sm:$0xf] }
  0x79   :  { %1496 = vmatpush.bf16.msra.mxu0 %v2417_v9  ;;  %v3153_v52 = vld [vmem:[#allocation5 + $0x294] sm:$0xf0]  ;;  %v2798_v54 = vld [vmem:[#allocation5 + $0x510] sm:$0xf0]  ;;  %v2660_v55 = vld [vmem:[#allocation5 + $0x3e8] sm:$0xf]  ;;  %v2229_v58 = vor.u32 %v3089_v49, %v2228_v48 }
  0x7a   :  { %1510 = vmatpush.bf16.msra.mxu1 %v2545_v10  ;;  %1524 = vmatpush.bf16.msra.mxu3 %v2673_v13  ;;  %v3197_v56 = vld [vmem:[#allocation5 + $0x3f4] sm:$0xf0]  ;;  %v2356_v59 = vld [vmem:[#allocation5 + $0x188] sm:$0xf]  ;;  %v2485_v61 = vor.u32 %v3153_v52, %v2484_v51  ;;  %v2801_v0 = vor.u32 %v3230_v53, %v2798_v54 }
  0x7b   :  { %v3121_v60 = vld [vmem:[#allocation5 + $0x194] sm:$0xf0]  ;;  %v2212_v62 = vld [vmem:[#allocation5 + $0x68] sm:$0xf] }
  0x7c   :  { %1534 = vmatpush.bf16.msrb.mxu2 %v2865_v3  ;;  %1497 = vmatmul.bf16.vlgmr.msra.gmra.mxu0 %v3494_v34  ;;  %v3085_v63 = vld [vmem:[#allocation5 + $0x74] sm:$0xf0]  ;;  %v2468_v1 = vld [vmem:[#allocation5 + $0x268] sm:$0xf]  ;;  %v2661_v3 = vor.u32 %v3197_v56, %v2660_v55  ;;  %v2357_v6 = vor.u32 %v3121_v60, %v2356_v59 }
  0x7d   :  { %1587 = vmatpush.bf16.msrb.mxu0 %v2533_v19  ;;  %1525 = vmatmul.bf16.vlgmr.msra.gmra.mxu3 %v3514_v12  ;;  %v3149_v2 = vld [vmem:[#allocation5 + $0x274] sm:$0xf0]  ;;  %v2644_v4 = vld [vmem:[#allocation5 + $0x3c8] sm:$0xf]  ;;  %v2213_v7 = vor.u32 %v3085_v63, %v2212_v62 }
  0x7e   :  { %1559 = vmatpush.bf16.msrb.mxu1 %v2277_v14  ;;  %1552 = vmatpush.bf16.msrb.mxu3 %v2929_v16  ;;  %v3193_v5 = vld [vmem:[#allocation5 + $0x3d4] sm:$0xf0]  ;;  %v2340_v8 = vld [vmem:[#allocation5 + $0x168] sm:$0xf]  ;;  %v2469_v10 = vor.u32 %v3149_v2, %v2468_v1  ;;  %v3131_v1 = vld [vmem:[#allocation5 + $0x1ec] sm:$0xf] }
  0x7f   :  { %1511 = vmatmul.bf16.vlgmr.msra.gmra.mxu1 %v3498_v40  ;;  %v3117_v9 = vld [vmem:[#allocation5 + $0x174] sm:$0xf0]  ;;  %v2196_v13 = vld [vmem:[#allocation5 + $0x48] sm:$0xf]  ;;  %v2645_v18 = vor.u32 %v3193_v5, %v2644_v4  ;;  %v2406_v2 = vld [vmem:[#allocation5 + $0x1f8] sm:$0xf0] }
  0x80   :  { %1535 = vmatpush.bf16.msrb.mxu2 %v2849_v22  ;;  %v3081_v14 = vld [vmem:[#allocation5 + $0x54] sm:$0xf0]  ;;  %v2452_v15 = vld [vmem:[#allocation5 + $0x248] sm:$0xf]  ;;  %v2341_v21 = vor.u32 %v3117_v9, %v2340_v8  ;;  %v2409_v9 = vor.u32 %v3131_v1, %v2406_v2 }
  0x81   :  { %1588 = vmatpush.bf16.msrb.mxu0 %v2517_v31  ;;  %v3145_v16 = vld [vmem:[#allocation5 + $0x254] sm:$0xf0]  ;;  %v2628_v19 = vld [vmem:[#allocation5 + $0x3a8] sm:$0xf]  ;;  %v2197_v22 = vor.u32 %v3081_v14, %v2196_v13 }
  0x82   :  { %1573 = vmatpush.bf16.msra.mxu3 %v2405_v26  ;;  %1560 = vmatpush.bf16.msrb.mxu1 %v2261_v28  ;;  %v3189_v20 = vld [vmem:[#allocation5 + $0x3b4] sm:$0xf0]  ;;  %v2324_v23 = vld [vmem:[#allocation5 + $0x148] sm:$0xf]  ;;  %v2453_v25 = vor.u32 %v3145_v16, %v2452_v15  ;;  %v3127_v16 = vld [vmem:[#allocation5 + $0x1cc] sm:$0xf] }
  0x83   :  { %v3113_v24 = vld [vmem:[#allocation5 + $0x154] sm:$0xf0]  ;;  %v2180_v27 = vld [vmem:[#allocation5 + $0x28] sm:$0xf]  ;;  %v2629_v30 = vor.u32 %v3189_v20, %v2628_v19 }
  0x84   :  { %1536 = vmatpush.bf16.msrb.mxu2 %v2833_v36  ;;  %v3077_v26 = vld [vmem:[#allocation5 + $0x34] sm:$0xf0]  ;;  %v2436_v28 = vld [vmem:[#allocation5 + $0x228] sm:$0xf]  ;;  %v2325_v33 = vor.u32 %v3113_v24, %v2324_v23 }
  0x85   :  { %1589 = vmatpush.bf16.msrb.mxu0 %v2501_v47  ;;  %v3141_v29 = vld [vmem:[#allocation5 + $0x234] sm:$0xf0]  ;;  %v2612_v31 = vld [vmem:[#allocation5 + $0x388] sm:$0xf]  ;;  %v2181_v36 = vor.u32 %v3077_v26, %v2180_v27 }
  0x86   :  { %1574 = vmatpush.bf16.msra.mxu3 %v2389_v43  ;;  %1561 = vmatpush.bf16.msrb.mxu1 %v2245_v44  ;;  %v3185_v32 = vld [vmem:[#allocation5 + $0x394] sm:$0xf0]  ;;  %v2308_v37 = vld [vmem:[#allocation5 + $0x128] sm:$0xf]  ;;  %v2437_v39 = vor.u32 %v3141_v29, %v2436_v28  ;;  %v3123_v29 = vld [vmem:[#allocation5 + $0x1ac] sm:$0xf] }
  0x87   :  { %v3109_v38 = vld [vmem:[#allocation5 + $0x134] sm:$0xf0]  ;;  %v2164_v42 = vld [vmem:[#allocation5 + $0x8] sm:$0xf]  ;;  %v2613_v48 = vor.u32 %v3185_v32, %v2612_v31 }
  0x88   :  { %1537 = vmatpush.bf16.msrb.mxu2 %v2817_v50  ;;  %v3073_v43 = vld [vmem:[#allocation5 + $0x14] sm:$0xf0]  ;;  %v2788_v44 = vld [vmem:[#allocation5 + $0x4e8] sm:$0xf]  ;;  %v2309_v53 = vor.u32 %v3109_v38, %v2308_v37 }
  0x89   :  { %1590 = vmatpush.bf16.msrb.mxu0 %v2485_v61  ;;  %v3229_v45 = vld [vmem:[#allocation5 + $0x4f4] sm:$0xf0]  ;;  %v2420_v46 = vld [vmem:[#allocation5 + $0x208] sm:$0xf]  ;;  %v2165_v54 = vor.u32 %v3073_v43, %v2164_v42 }
  0x8a   :  { %1575 = vmatpush.bf16.msra.mxu3 %v2373_v57  ;;  %1562 = vmatpush.bf16.msrb.mxu1 %v2229_v58  ;;  %v3137_v47 = vld [vmem:[#allocation5 + $0x214] sm:$0xf0]  ;;  %v2932_v49 = vld [vmem:[#allocation5 + $0x608] sm:$0xf]  ;;  %v2789_v55 = vor.u32 %v3229_v45, %v2788_v44 }
  0x8b   :  { %v3265_v50 = vld [vmem:[#allocation5 + $0x614] sm:$0xf0]  ;;  %v2596_v51 = vld [vmem:[#allocation5 + $0x368] sm:$0xf]  ;;  %v2421_v58 = vor.u32 %v3137_v47, %v2420_v46  ;;  %v3119_v47 = vld [vmem:[#allocation5 + $0x18c] sm:$0xf] }
  0x8c   :  { %1538 = vmatpush.bf16.msrb.mxu2 %v2801_v0  ;;  %v3181_v52 = vld [vmem:[#allocation5 + $0x374] sm:$0xf0]  ;;  %v2292_v56 = vld [vmem:[#allocation5 + $0x108] sm:$0xf]  ;;  %v2933_v63 = vor.u32 %v3265_v50, %v2932_v49  ;;  %v3095_v50 = vld [vmem:[#allocation5 + $0xcc] sm:$0xf] }
  0x8d   :  { %1591 = vmatpush.bf16.msrb.mxu0 %v2469_v10  ;;  %2939 = vmatmul.msk.bf16.vlgmr.msrb.gmra.mxu3 %vm1359_vm0, %v3511_v11  ;;  %v3105_v57 = vld [vmem:[#allocation5 + $0x114] sm:$0xf0]  ;;  %v2916_v59 = vld [vmem:[#allocation5 + $0x5e8] sm:$0xf]  ;;  %v2597_v0 = vor.u32 %v3181_v52, %v2596_v51  ;;  %v2262_v51 = vld [vmem:[#allocation5 + $0xd8] sm:$0xf0] }
  0x8e   :  { %1576 = vmatpush.bf16.msra.mxu3 %v2357_v6  ;;  %1563 = vmatpush.bf16.msrb.mxu1 %v2213_v7  ;;  %v3261_v60 = vld [vmem:[#allocation5 + $0x5f4] sm:$0xf0]  ;;  %v2772_v61 = vld [vmem:[#allocation5 + $0x4c8] sm:$0xf]  ;;  %v2293_v5 = vor.u32 %v3105_v57, %v2292_v56 }
  0x8f   :  { %1539 = vmatmul.bf16.vlgmr.msrb.gmra.mxu2 %v3517_v17  ;;  %v3225_v62 = vld [vmem:[#allocation5 + $0x4d4] sm:$0xf0]  ;;  %v2917_v6 = vor.u32 %v3261_v60, %v2916_v59  ;;  %v2900_v8 = vld [vmem:[#allocation5 + $0x5c8] sm:$0xf]  ;;  %v3115_v59 = vld [vmem:[#allocation5 + $0x16c] sm:$0xf] }
  0x90   :  { %1601 = vmatpush.bf16.msra.mxu2 %v2661_v3  ;;  %v2580_v3 = vld [vmem:[#allocation5 + $0x348] sm:$0xf]  ;;  %v3177_v4 = vld [vmem:[#allocation5 + $0x354] sm:$0xf0]  ;;  %v2773_v7 = vor.u32 %v3225_v62, %v2772_v61  ;;  %v2342_v60 = vld [vmem:[#allocation5 + $0x178] sm:$0xf0]  ;;  %v2265_v61 = vor.u32 %v3095_v50, %v2262_v51 }
  0x91   :  { %1592 = vmatpush.bf16.msrb.mxu0 %v2453_v25  ;;  %v3257_v10 = vld [vmem:[#allocation5 + $0x5d4] sm:$0xf0]  ;;  %v2756_v13 = vld [vmem:[#allocation5 + $0x4a8] sm:$0xf]  ;;  %v2581_v15 = vor.u32 %v3177_v4, %v2580_v3  ;;  %v3091_v62 = vld [vmem:[#allocation5 + $0xac] sm:$0xf]  ;;  %v2345_v3 = vor.u32 %v3115_v59, %v2342_v60 }
  0x92   :  { %1577 = vmatpush.bf16.msra.mxu3 %v2341_v21  ;;  %1564 = vmatpush.bf16.msrb.mxu1 %v2197_v22  ;;  %v3221_v14 = vld [vmem:[#allocation5 + $0x4b4] sm:$0xf0]  ;;  %v2564_v19 = vld [vmem:[#allocation5 + $0x328] sm:$0xf]  ;;  %v2901_v21 = vor.u32 %v3257_v10, %v2900_v8  ;;  %v2326_v8 = vld [vmem:[#allocation5 + $0x158] sm:$0xf0] }
  0x93   :  { %v3173_v20 = vld [vmem:[#allocation5 + $0x334] sm:$0xf0]  ;;  %v2757_v22 = vor.u32 %v3221_v14, %v2756_v13  ;;  %v2884_v23 = vld [vmem:[#allocation5 + $0x5a8] sm:$0xf]  ;;  %v3087_v10 = vld [vmem:[#allocation5 + $0x8c] sm:$0xf] }
  0x94   :  { %1602 = vmatpush.bf16.msra.mxu2 %v2645_v18  ;;  %v2390_v18 = vld [vmem:[#allocation5 + $0x1d8] sm:$0xf0]  ;;  %v3253_v25 = vld [vmem:[#allocation5 + $0x5b4] sm:$0xf0]  ;;  %v2740_v27 = vld [vmem:[#allocation5 + $0x488] sm:$0xf]  ;;  %v2565_v28 = vor.u32 %v3173_v20, %v2564_v19 }
  0x95   :  { %1593 = vmatpush.bf16.msrb.mxu0 %v2437_v39  ;;  %v2393_v24 = vor.u32 %v3127_v16, %v2390_v18  ;;  %v3217_v26 = vld [vmem:[#allocation5 + $0x494] sm:$0xf0]  ;;  %v2548_v31 = vld [vmem:[#allocation5 + $0x308] sm:$0xf]  ;;  %v2885_v37 = vor.u32 %v3253_v25, %v2884_v23  ;;  %v2230_v13 = vld [vmem:[#allocation5 + $0x98] sm:$0xf0] }
  0x96   :  { %1578 = vmatpush.bf16.msra.mxu3 %v2325_v33  ;;  %1565 = vmatpush.bf16.msrb.mxu1 %v2181_v36  ;;  %v3169_v32 = vld [vmem:[#allocation5 + $0x314] sm:$0xf0]  ;;  %v3099_v33 = vld [vmem:[#allocation5 + $0xec] sm:$0xf]  ;;  %v2278_v36 = vld [vmem:[#allocation5 + $0xf8] sm:$0xf0]  ;;  %v2741_v38 = vor.u32 %v3217_v26, %v2740_v27  ;;  %v2233_v27 = vor.u32 %v3087_v10, %v2230_v13 }
  0x97   :  { %v2868_v39 = vld [vmem:[#allocation5 + $0x588] sm:$0xf]  ;;  %v3249_v43 = vld [vmem:[#allocation5 + $0x594] sm:$0xf0]  ;;  %v2549_v46 = vor.u32 %v3169_v32, %v2548_v31  ;;  %v2281_v49 = vor.u32 %v3099_v33, %v2278_v36  ;;  %v2534_v23 = vld [vmem:[#allocation5 + $0x2f8] sm:$0xf0] }
  0x98   :  { %1603 = vmatpush.bf16.msra.mxu2 %v2629_v30  ;;  %v2374_v30 = vld [vmem:[#allocation5 + $0x1b8] sm:$0xf0]  ;;  %v2724_v44 = vld [vmem:[#allocation5 + $0x468] sm:$0xf]  ;;  %v3213_v45 = vld [vmem:[#allocation5 + $0x474] sm:$0xf0]  ;;  %v2869_v52 = vor.u32 %v3249_v43, %v2868_v39 }
  0x99   :  { %1594 = vmatpush.bf16.msrb.mxu0 %v2421_v58  ;;  %v2377_v42 = vor.u32 %v3123_v29, %v2374_v30  ;;  %v3245_v56 = vld [vmem:[#allocation5 + $0x574] sm:$0xf0]  ;;  %v2708_v57 = vld [vmem:[#allocation5 + $0x448] sm:$0xf]  ;;  %v2310_v25 = vld [vmem:[#allocation5 + $0x138] sm:$0xf0] }
  0x9a   :  { %1579 = vmatpush.bf16.msra.mxu3 %v2309_v53  ;;  %1566 = vmatpush.bf16.msrb.mxu1 %v2165_v54  ;;  %v2725_v53 = vor.u32 %v3213_v45, %v2724_v44  ;;  %v2852_v54 = vld [vmem:[#allocation5 + $0x568] sm:$0xf]  ;;  %v3209_v58 = vld [vmem:[#allocation5 + $0x454] sm:$0xf0]  ;;  %v3083_v26 = vld [vmem:[#allocation5 + $0x6c] sm:$0xf] }
  0x9b   :  { %v2709_v1 = vor.u32 %v3209_v58, %v2708_v57  ;;  %v2836_v2 = vld [vmem:[#allocation5 + $0x548] sm:$0xf]  ;;  %v3241_v4 = vld [vmem:[#allocation5 + $0x554] sm:$0xf0]  ;;  %v3159_v39 = vld [vmem:[#allocation5 + $0x2cc] sm:$0xf] }
  0x9c   :  { %1604 = vmatpush.bf16.msra.mxu2 %v2613_v48  ;;  %1595 = vmatmul.bf16.vlgmr.msrb.gmra.mxu0 %v3494_v34  ;;  %v2358_v48 = vld [vmem:[#allocation5 + $0x198] sm:$0xf0]  ;;  %v2837_v14 = vor.u32 %v3241_v4, %v2836_v2  ;;  %v2820_v16 = vld [vmem:[#allocation5 + $0x528] sm:$0xf]  ;;  %v3237_v18 = vld [vmem:[#allocation5 + $0x534] sm:$0xf0] }
  0x9d   :  { %1650 = vmatpush.bf16.msra.mxu0 %v2933_v63  ;;  %1567 = vmatmul.bf16.vlgmr.msrb.gmra.mxu1 %v3496_v35  ;;  %v2246_v63 = vld [vmem:[#allocation5 + $0xb8] sm:$0xf0]  ;;  %v2676_v20 = vld [vmem:[#allocation5 + $0x408] sm:$0xf]  ;;  %v2821_v29 = vor.u32 %v3237_v18, %v2820_v16  ;;  %v3233_v36 = vld [vmem:[#allocation5 + $0x514] sm:$0xf0] }
  0x9e   :  { %1615 = vmatpush.bf16.msra.mxu1 %v2789_v55  ;;  %1580 = vmatpush.bf16.msra.mxu3 %v2293_v5  ;;  %v2361_v55 = vor.u32 %v3119_v47, %v2358_v48  ;;  %v2692_v5 = vld [vmem:[#allocation5 + $0x428] sm:$0xf]  ;;  %v3103_v44 = vld [vmem:[#allocation5 + $0x10c] sm:$0xf]  ;;  %v2294_v45 = vld [vmem:[#allocation5 + $0x118] sm:$0xf0] }
  0x9f   :  { %v2804_v33 = vld [vmem:[#allocation5 + $0x508] sm:$0xf]  ;;  %v2198_v47 = vld [vmem:[#allocation5 + $0x58] sm:$0xf0]  ;;  %v3259_v51 = vld [vmem:[#allocation5 + $0x5ec] sm:$0xf] }
  0xa0   :  { %1605 = vmatpush.bf16.msra.mxu2 %v2597_v0  ;;  %v2853_v0 = vor.u32 %v3245_v56, %v2852_v54  ;;  %v2805_v48 = vor.u32 %v3233_v36, %v2804_v33  ;;  %v2297_v54 = vor.u32 %v3103_v44, %v2294_v45  ;;  %v3155_v56 = vld [vmem:[#allocation5 + $0x2ac] sm:$0xf]  ;;  %v2502_v57 = vld [vmem:[#allocation5 + $0x2b8] sm:$0xf0] }
  0xa1   :  { %1671 = vmatpush.bf16.msrb.mxu0 %v2409_v9  ;;  %1581 = vmatmul.bf16.vlgmr.msra.gmra.mxu3 %v3500_v41  ;;  %v2249_v9 = vor.u32 %v3091_v62, %v2246_v63  ;;  %v3075_v59 = vld [vmem:[#allocation5 + $0x2c] sm:$0xf]  ;;  %v2182_v60 = vld [vmem:[#allocation5 + $0x38] sm:$0xf0]  ;;  %v2505_v63 = vor.u32 %v3155_v56, %v2502_v57 }
  0xa2   :  { %1629 = vmatpush.bf16.msrb.mxu3 %v2917_v6  ;;  %1616 = vmatpush.bf16.msra.mxu1 %v2773_v7  ;;  %v3205_v6 = vld [vmem:[#allocation5 + $0x434] sm:$0xf0]  ;;  %v3111_v7 = vld [vmem:[#allocation5 + $0x14c] sm:$0xf]  ;;  %v2790_v10 = vld [vmem:[#allocation5 + $0x4f8] sm:$0xf0] }
  0xa3   :  { %v2329_v19 = vor.u32 %v3111_v7, %v2326_v8  ;;  %v3187_v2 = vld [vmem:[#allocation5 + $0x3ac] sm:$0xf]  ;;  %v2166_v8 = vld [vmem:[#allocation5 + $0x18] sm:$0xf0] }
  0xa4   :  { %1606 = vmatpush.bf16.msra.mxu2 %v2581_v15  ;;  %v2693_v15 = vor.u32 %v3205_v6, %v2692_v5  ;;  %v3151_v4 = vld [vmem:[#allocation5 + $0x28c] sm:$0xf]  ;;  %v2486_v5 = vld [vmem:[#allocation5 + $0x298] sm:$0xf0]  ;;  %v2185_v6 = vor.u32 %v3075_v59, %v2182_v60 }
  0xa5   :  { %1672 = vmatpush.bf16.msrb.mxu0 %v2393_v24  ;;  %v3107_v24 = vld [vmem:[#allocation5 + $0x12c] sm:$0xf]  ;;  %v2886_v18 = vld [vmem:[#allocation5 + $0x5b8] sm:$0xf0] }
  0xa6   :  { %1630 = vmatpush.bf16.msrb.mxu3 %v2901_v21  ;;  %1617 = vmatpush.bf16.msra.mxu1 %v2757_v22  ;;  %v3201_v21 = vld [vmem:[#allocation5 + $0x414] sm:$0xf0]  ;;  %v3163_v22 = vld [vmem:[#allocation5 + $0x2ec] sm:$0xf]  ;;  %v2313_v32 = vor.u32 %v3107_v24, %v2310_v25  ;;  %v2598_v33 = vld [vmem:[#allocation5 + $0x378] sm:$0xf0] }
  0xa7   :  { %v2677_v30 = vor.u32 %v3201_v21, %v2676_v20  ;;  %v2537_v31 = vor.u32 %v3163_v22, %v2534_v23  ;;  %v3071_v7 = vld [vmem:[#allocation5 + $0xc] sm:$0xf]  ;;  %v2614_v20 = vld [vmem:[#allocation5 + $0x398] sm:$0xf0] }
  0xa8   :  { %1607 = vmatpush.bf16.msra.mxu2 %v2565_v28  ;;  %v2214_v28 = vld [vmem:[#allocation5 + $0x78] sm:$0xf0]  ;;  %v3251_v16 = vld [vmem:[#allocation5 + $0x5ac] sm:$0xf]  ;;  %v2169_v23 = vor.u32 %v3071_v7, %v2166_v8 }
  0xa9   :  { %1673 = vmatpush.bf16.msrb.mxu0 %v2377_v42  ;;  %v2518_v42 = vld [vmem:[#allocation5 + $0x2d8] sm:$0xf0]  ;;  %v2217_v43 = vor.u32 %v3083_v26, %v2214_v28  ;;  %v3147_v21 = vld [vmem:[#allocation5 + $0x26c] sm:$0xf]  ;;  %v2889_v26 = vor.u32 %v3251_v16, %v2886_v18 }
  0xaa   :  { %1631 = vmatpush.bf16.msrb.mxu3 %v2885_v37  ;;  %1618 = vmatpush.bf16.msra.mxu1 %v2741_v38  ;;  %v3195_v37 = vld [vmem:[#allocation5 + $0x3ec] sm:$0xf]  ;;  %v2662_v38 = vld [vmem:[#allocation5 + $0x3f8] sm:$0xf0]  ;;  %v2521_v50 = vor.u32 %v3159_v39, %v2518_v42 }
  0xab   :  { %v2470_v22 = vld [vmem:[#allocation5 + $0x278] sm:$0xf0]  ;;  %v3223_v25 = vld [vmem:[#allocation5 + $0x4cc] sm:$0xf] }
  0xac   :  { %1608 = vmatpush.bf16.msra.mxu2 %v2549_v46  ;;  %2940 = vmatmul.msk.bf16.vlgmr.msra.gmra.mxu0 %vm1359_vm0, %v3511_v11  ;;  %v3079_v46 = vld [vmem:[#allocation5 + $0x4c] sm:$0xf]  ;;  %v2758_v39 = vld [vmem:[#allocation5 + $0x4b8] sm:$0xf0] }
  0xad   :  { %1674 = vmatpush.bf16.msrb.mxu0 %v2361_v55  ;;  %v2646_v55 = vld [vmem:[#allocation5 + $0x3d8] sm:$0xf0]  ;;  %v2201_v58 = vor.u32 %v3079_v46, %v2198_v47  ;;  %v3143_v36 = vld [vmem:[#allocation5 + $0x24c] sm:$0xf] }
  0xae   :  { %1632 = vmatpush.bf16.msrb.mxu3 %v2869_v52  ;;  %1619 = vmatpush.bf16.msra.mxu1 %v2725_v53  ;;  %v2918_v52 = vld [vmem:[#allocation5 + $0x5f8] sm:$0xf0]  ;;  %v3191_v53 = vld [vmem:[#allocation5 + $0x3cc] sm:$0xf] }
  0xaf   :  { %1609 = vmatmul.bf16.vlgmr.msra.gmra.mxu2 %v3498_v40  ;;  %v2649_v62 = vor.u32 %v3191_v53, %v2646_v55  ;;  %v3243_v45 = vld [vmem:[#allocation5 + $0x56c] sm:$0xf]  ;;  %v2854_v46 = vld [vmem:[#allocation5 + $0x578] sm:$0xf0] }
  0xb0   :  { %1657 = vmatpush.bf16.msrb.mxu2 %v2281_v49  ;;  %v2665_v49 = vor.u32 %v3195_v37, %v2662_v38  ;;  %v2454_v37 = vld [vmem:[#allocation5 + $0x258] sm:$0xf0]  ;;  %v3219_v38 = vld [vmem:[#allocation5 + $0x4ac] sm:$0xf] }
  0xb1   :  { %1675 = vmatpush.bf16.msrb.mxu0 %v2345_v3  ;;  %v2630_v3 = vld [vmem:[#allocation5 + $0x3b8] sm:$0xf0]  ;;  %v2457_v44 = vor.u32 %v3143_v36, %v2454_v37  ;;  %v3175_v47 = vld [vmem:[#allocation5 + $0x34c] sm:$0xf] }
  0xb2   :  { %1633 = vmatpush.bf16.msrb.mxu3 %v2853_v0  ;;  %1620 = vmatpush.bf16.msra.mxu1 %v2709_v1  ;;  %v3255_v0 = vld [vmem:[#allocation5 + $0x5cc] sm:$0xf]  ;;  %v2902_v1 = vld [vmem:[#allocation5 + $0x5d8] sm:$0xf0] }
  0xb3   :  { %v2905_v13 = vor.u32 %v3255_v0, %v2902_v1  ;;  %v2742_v53 = vld [vmem:[#allocation5 + $0x498] sm:$0xf0]  ;;  %v3239_v57 = vld [vmem:[#allocation5 + $0x54c] sm:$0xf] }
  0xb4   :  { %1658 = vmatpush.bf16.msrb.mxu2 %v2265_v61  ;;  %v2921_v61 = vor.u32 %v3259_v51, %v2918_v52  ;;  %v2761_v51 = vor.u32 %v3219_v38, %v2758_v39  ;;  %v3215_v52 = vld [vmem:[#allocation5 + $0x48c] sm:$0xf]  ;;  %v2566_v60 = vld [vmem:[#allocation5 + $0x338] sm:$0xf0] }
  0xb5   :  { %1676 = vmatpush.bf16.msrb.mxu0 %v2329_v19  ;;  %v3183_v19 = vld [vmem:[#allocation5 + $0x38c] sm:$0xf]  ;;  %v2745_v0 = vor.u32 %v3215_v52, %v2742_v53  ;;  %v2822_v7 = vld [vmem:[#allocation5 + $0x538] sm:$0xf0] }
  0xb6   :  { %1634 = vmatpush.bf16.msrb.mxu3 %v2837_v14  ;;  %1621 = vmatpush.bf16.msra.mxu1 %v2693_v15  ;;  %v2633_v14 = vor.u32 %v3187_v2, %v2630_v3  ;;  %v2489_v15 = vor.u32 %v3151_v4, %v2486_v5  ;;  %v2617_v28 = vor.u32 %v3183_v19, %v2614_v20  ;;  %v3171_v59 = vld [vmem:[#allocation5 + $0x32c] sm:$0xf]  ;;  %v2726_v3 = vld [vmem:[#allocation5 + $0x478] sm:$0xf0] }
  0xb7   :  { %v3211_v1 = vld [vmem:[#allocation5 + $0x46c] sm:$0xf]  ;;  %v2569_v4 = vor.u32 %v3171_v59, %v2566_v60  ;;  %v2710_v16 = vld [vmem:[#allocation5 + $0x458] sm:$0xf0] }
  0xb8   :  { %1659 = vmatpush.bf16.msrb.mxu2 %v2249_v9  ;;  %v3227_v9 = vld [vmem:[#allocation5 + $0x4ec] sm:$0xf]  ;;  %v3273_v19 = vld [vmem:[#allocation8 + $0x38] sm:$0xff] }
  0xb9   :  { %1677 = vmatpush.bf16.msrb.mxu0 %v2313_v32  ;;  %v2793_v24 = vor.u32 %v3227_v9, %v2790_v10  ;;  %v3179_v32 = vld [vmem:[#allocation5 + $0x36c] sm:$0xf]  ;;  %v2550_v9 = vld [vmem:[#allocation5 + $0x318] sm:$0xf0] }
  0xba   :  { %1635 = vmatpush.bf16.msrb.mxu3 %v2821_v29  ;;  %1622 = vmatpush.bf16.msra.mxu1 %v2677_v30  ;;  %v2473_v29 = vor.u32 %v3147_v21, %v2470_v22  ;;  %v3247_v30 = vld [vmem:[#allocation5 + $0x58c] sm:$0xf]  ;;  %v2806_v21 = vld [vmem:[#allocation5 + $0x518] sm:$0xf0] }
  0xbb   :  { %v3167_v8 = vld [vmem:[#allocation5 + $0x30c] sm:$0xf]  ;;  %v2678_v36 = vld [vmem:[#allocation5 + $0x418] sm:$0xf0] }
  0xbc   :  { %1660 = vmatpush.bf16.msrb.mxu2 %v2233_v27  ;;  %v2774_v27 = vld [vmem:[#allocation5 + $0x4d8] sm:$0xf0]  ;;  %v2553_v18 = vor.u32 %v3167_v8, %v2550_v9  ;;  %v3231_v20 = vld [vmem:[#allocation5 + $0x50c] sm:$0xf] }
  0xbd   :  { %1623 = vmatmul.bf16.vlgmr.msra.gmra.mxu1 %v3514_v12  ;;  %1678 = vmatpush.bf16.msrb.mxu0 %v2297_v54  ;;  %v2857_v54 = vor.u32 %v3243_v45, %v2854_v46  ;;  %v3271_v37 = vld [vmem:[#allocation8 + $0x28] sm:$0xff]  ;;  %v3277_v9 = vld [vmem:[#allocation8 + $0x58] sm:$0xff] }
  0xbe   :  { %1685 = vmatpush.bf16.msrb.mxu1 %v2537_v31  ;;  %1636 = vmatpush.bf16.msrb.mxu3 %v2805_v48  ;;  %v2870_v31 = vld [vmem:[#allocation5 + $0x598] sm:$0xf0] }
  0xbf   :  { %v2873_v42 = vor.u32 %v3247_v30, %v2870_v31  ;;  %v2582_v48 = vld [vmem:[#allocation5 + $0x358] sm:$0xf0] }
  0xc0   :  { %1661 = vmatpush.bf16.msrb.mxu2 %v2217_v43  ;;  %1679 = vmatmul.bf16.vlgmr.msrb.gmra.mxu0 %v3500_v41  ;;  %v2777_v41 = vor.u32 %v3223_v25, %v2774_v27  ;;  %v2601_v43 = vor.u32 %v3179_v32, %v2598_v33  ;;  %v2585_v55 = vor.u32 %v3175_v47, %v2582_v48  ;;  %v3540_v25 = vld [vmem:[#allocation7] sm:$0xf]  ;;  %v3203_v27 = vld [vmem:[#allocation5 + $0x42c] sm:$0xf] }
  0xc1   :  { %1637 = vmatmul.bf16.vlgmr.msrb.gmra.mxu3 %v3517_v17  ;;  %1727 = vmatpush.bf16.msra.mxu0 %v2921_v61  ;;  %v3135_v61 = vld [vmem:[#allocation5 + $0x20c] sm:$0xf]  ;;  %v371_v30 = vperm.slane %v3540_v25, 0 }
  0xc2   :  { %1699 = vmatpush.bf16.msra.mxu3 %v2665_v49  ;;  %1686 = vmatpush.bf16.msrb.mxu1 %v2521_v50  ;;  %v3139_v49 = vld [vmem:[#allocation5 + $0x22c] sm:$0xf]  ;;  %v2438_v50 = vld [vmem:[#allocation5 + $0x238] sm:$0xf0] }
  0xc3   :  { %v2441_v56 = vor.u32 %v3139_v49, %v2438_v50  ;;  %v3199_v33 = vld [vmem:[#allocation5 + $0x40c] sm:$0xf]  ;;  %v3281_v49 = vld [vmem:[#allocation8 + $0x78] sm:$0xff] }
  0xc4   :  { %1662 = vmatpush.bf16.msrb.mxu2 %v2201_v58  ;;  %v2838_v58 = vld [vmem:[#allocation5 + $0x558] sm:$0xf0]  ;;  %v2681_v38 = vor.u32 %v3199_v33, %v2678_v36 }
  0xc5   :  { %1728 = vmatpush.bf16.msra.mxu0 %v2905_v13  ;;  %v2841_v2 = vor.u32 %v3239_v57, %v2838_v58  ;;  %v2729_v13 = vor.u32 %v3211_v1, %v2726_v3  ;;  %v3279_v1 = vld [vmem:[#allocation8 + $0x68] sm:$0xff] }
  0xc6   :  { %1700 = vmatpush.bf16.msra.mxu3 %v2649_v62  ;;  %1687 = vmatpush.bf16.msrb.mxu1 %v2505_v63  ;;  %v2422_v62 = vld [vmem:[#allocation5 + $0x218] sm:$0xf0] }
  0xc7   :  { %v2934_v63 = vld [vmem:[#allocation5 + $0x618] sm:$0xf0]  ;;  %v2425_v5 = vor.u32 %v3135_v61, %v2422_v62  ;;  %v3266_v62 = vld [vmem:[#allocation8] sm:$0xff] }
  0xc8   :  { %1663 = vmatpush.bf16.msrb.mxu2 %v2185_v6  ;;  %v3235_v6 = vld [vmem:[#allocation5 + $0x52c] sm:$0xf] }
  0xc9   :  { %1729 = vmatpush.bf16.msra.mxu0 %v2889_v26  ;;  %v2694_v26 = vld [vmem:[#allocation5 + $0x438] sm:$0xf0] }
  0xca   :  { %1701 = vmatpush.bf16.msra.mxu3 %v2633_v14  ;;  %1688 = vmatpush.bf16.msrb.mxu1 %v2489_v15  ;;  %v2825_v14 = vor.u32 %v3235_v6, %v2822_v7  ;;  %v3207_v15 = vld [vmem:[#allocation5 + $0x44c] sm:$0xf]  ;;  %v2697_v31 = vor.u32 %v3203_v27, %v2694_v26  ;;  %v3278_v7 = vld [vmem:[#allocation8 + $0x60] sm:$0xff] }
  0xcc   :  { %1664 = vmatpush.bf16.msrb.mxu2 %v2169_v23  ;;  %v1372_v22 = vpop.f32.mrf.mxu0 }
  0xcd   :  { %1730 = vmatpush.bf16.msra.mxu0 %v2873_v42 }
  0xce   :  { %1702 = vmatpush.bf16.msra.mxu3 %v2617_v28  ;;  %1689 = vmatpush.bf16.msrb.mxu1 %v2473_v29  ;;  %v1386_v23 = vpop.f32.mrf.mxu1  ;;  %v2809_v28 = vor.u32 %v3231_v20, %v2806_v21  ;;  %v3272_v29 = vld [vmem:[#allocation8 + $0x30] sm:$0xff]  ;;  %v3274_v21 = vld [vmem:[#allocation8 + $0x40] sm:$0xff] }
  0xcf   :  { %1665 = vmatmul.bf16.vlgmr.msrb.gmra.mxu2 %v3496_v35  ;;  %v3263_v35 = vld [vmem:[#allocation5 + $0x60c] sm:$0xf] }
  0xd0   :  { %1713 = vmatpush.bf16.msra.mxu2 %v2793_v24  ;;  %v2937_v10 = vor.u32 %v3263_v35, %v2934_v63  ;;  %v2713_v24 = vor.u32 %v3207_v15, %v2710_v16  ;;  %v3280_v63 = vld [vmem:[#allocation8 + $0x70] sm:$0xff]  ;;  %v372_v16 = vperm.slane %v3540_v25, 1 }
  0xd1   :  { %1731 = vmatpush.bf16.msra.mxu0 %v2857_v54 }
  0xd2   :  { %1703 = vmatpush.bf16.msra.mxu3 %v2601_v43  ;;  %1690 = vmatpush.bf16.msrb.mxu1 %v2457_v44  ;;  %v1400_v32 = vpop.f32.mrf.mxu2  ;;  %v3270_v43 = vld [vmem:[#allocation8 + $0x20] sm:$0xff] }
  0xd4   :  { %1714 = vmatpush.bf16.msra.mxu2 %v2777_v41  ;;  %v1373_v41 = vadd.f32 %v1372_v22, %v371_v30  ;;  %v1374_v39 = vpop.f32.mrf.mxu0 }
  0xd5   :  { %1732 = vmatpush.bf16.msra.mxu0 %v2841_v2  ;;  %v1375_v45 = vadd.f32 %v1374_v39, %v371_v30 }
  0xd6   :  { %1704 = vmatpush.bf16.msra.mxu3 %v2585_v55  ;;  %1691 = vmatpush.bf16.msrb.mxu1 %v2441_v56  ;;  %v1388_v42 = vpop.f32.mrf.mxu1  ;;  %v1387_v44 = vadd.f32 %v1386_v23, %v1373_v41  ;;  %v3267_v56 = vld [vmem:[#allocation8 + $0x8] sm:$0xff] }
  0xd7   :  { %v1389_v48 = vadd.f32 %v1388_v42, %v1375_v45 }
  0xd8   :  { %1715 = vmatpush.bf16.msra.mxu2 %v2761_v51  ;;  %v1401_v47 = vadd.f32 %v1400_v32, %v1387_v44  ;;  %v3268_v51 = vld [vmem:[#allocation8 + $0x10] sm:$0xff] }
  0xd9   :  { %1733 = vmatpush.bf16.msra.mxu0 %v2825_v14 }
  0xda   :  { %1705 = vmatpush.bf16.msra.mxu3 %v2569_v4  ;;  %1692 = vmatpush.bf16.msrb.mxu1 %v2425_v5  ;;  %v1402_v46 = vpop.f32.mrf.mxu2 }
  0xdb   :  { %v1403_v54 = vadd.f32 %v1402_v46, %v1389_v48 }
  0xdc   :  { %1716 = vmatpush.bf16.msra.mxu2 %v2745_v0 }
  0xdd   :  { %1693 = vmatmul.bf16.vlgmr.msrb.gmra.mxu1 %v3494_v34  ;;  %1734 = vmatpush.bf16.msra.mxu0 %v2809_v28  ;;  %v1414_v34 = vpop.f32.mrf.mxu3 }
  0xde   :  { %1748 = vmatpush.bf16.msra.mxu1 %v2937_v10  ;;  %1706 = vmatpush.bf16.msra.mxu3 %v2553_v18  ;;  %v1415_v53 = vadd.f32 %v1414_v34, %v1401_v47  ;;  %v3275_v18 = vld [vmem:[#allocation8 + $0x48] sm:$0xff]  ;;  %v3289_v34 = vld [vmem:[#allocation8 + $0xb8] sm:$0xff] }
  0xdf   :  { %v3287_v47 = vld [vmem:[#allocation8 + $0xa8] sm:$0xff] }
  0xe0   :  { %1717 = vmatpush.bf16.msra.mxu2 %v2729_v13  ;;  %1735 = vmatmul.bf16.vlgmr.msra.gmra.mxu0 %v3517_v17  ;;  %v3276_v13 = vld [vmem:[#allocation8 + $0x50] sm:$0xff] }
  0xe1   :  { %1707 = vmatmul.bf16.vlgmr.msra.gmra.mxu3 %v3498_v40  ;;  %v3269_v40 = vld [vmem:[#allocation8 + $0x18] sm:$0xff] }
  0xe2   :  { %2027 = vmatpush.bf16.msrb.mxu3 %v3273_v19  ;;  %2041 = vmatpush.bf16.msrb.mxu1 %v3281_v49 }
  0xe4   :  { %1718 = vmatpush.bf16.msra.mxu2 %v2713_v24  ;;  %v1428_v50 = vpop.f32.mrf.mxu0 }
  0xe5   :  { %v1442_v17 = vpop.f32.mrf.mxu1  ;;  %v1416_v52 = vpop.f32.mrf.mxu3  ;;  %v1429_v55 = vadd.f32 %v1428_v50, %v1415_v53  ;;  %v3284_v53 = vld [vmem:[#allocation8 + $0x90] sm:$0xff] }
  0xe6   :  { %2028 = vmatpush.bf16.msrb.mxu3 %v3272_v29  ;;  %v1417_v58 = vadd.f32 %v1416_v52, %v1403_v54  ;;  %2042 = vmatpush.bf16.msrb.mxu1 %v3280_v63 }
  0xe7   :  { %v1443_v59 = vadd.f32 %v1442_v17, %v1429_v55  ;;  %v3286_v17 = vld [vmem:[#allocation8 + $0xa0] sm:$0xff] }
  0xe8   :  { %1719 = vmatpush.bf16.msra.mxu2 %v2697_v31 }
  0xea   :  { %2029 = vmatpush.bf16.msrb.mxu3 %v3271_v37  ;;  %v1456_v57 = vpop.f32.mrf.mxu2  ;;  %2043 = vmatpush.bf16.msrb.mxu1 %v3279_v1 }
  0xeb   :  { %v1457_v0 = vadd.f32 %v1456_v57, %v1443_v59  ;;  %v373_v57 = vperm.slane %v3540_v25, 2 }
  0xec   :  { %1720 = vmatpush.bf16.msra.mxu2 %v2681_v38 }
  0xed   :  { %2941 = vmatmul.msk.bf16.vlgmr.msra.gmra.mxu1 %vm1359_vm0, %v3511_v11  ;;  %v1444_v61 = vpop.f32.mrf.mxu1  ;;  %v1470_v35 = vpop.f32.mrf.mxu3  ;;  %v1755_v4 = vmax.f32 %v1457_v0, 0.0 }
  0xee   :  { %2030 = vmatpush.bf16.msrb.mxu3 %v3270_v43  ;;  %2044 = vmatpush.bf16.msrb.mxu1 %v3278_v7  ;;  %v1471_v20 = vadd.f32 %v1470_v35, %v372_v16  ;;  %v3288_v43 = vld [vmem:[#allocation8 + $0xb0] sm:$0xff] }
  0xef   :  { %1721 = vmatmul.bf16.vlgmr.msra.gmra.mxu2 %v3514_v12  ;;  %v1430_v12 = vpop.f32.mrf.mxu0 }
  0xf0   :  { %v1431_v60 = vadd.f32 %v1430_v12, %v1417_v58  ;;  %2055 = vmatpush.bf16.msrb.mxu2 %v3289_v34  ;;  %v3282_v58 = vld [vmem:[#allocation8 + $0x80] sm:$0xff] }
  0xf2   :  { %2031 = vmatpush.bf16.msrb.mxu3 %v3269_v40  ;;  %v1445_v11 = vadd.f32 %v1444_v61, %v1431_v60  ;;  %v1458_v2 = vpop.f32.mrf.mxu2  ;;  %2045 = vmatpush.bf16.msrb.mxu1 %v3277_v9  ;;  %v3297_v60 = vld [vmem:[#allocation8 + $0xf8] sm:$0xff] }
  0xf3   :  { %2069 = vmatpush.bf16.msrb.mxu0 %v3297_v60 }
  0xf4   :  { %v1459_v3 = vadd.f32 %v1458_v2, %v1445_v11  ;;  %2056 = vmatpush.bf16.msrb.mxu2 %v3288_v43  ;;  %v3296_v11 = vld [vmem:[#allocation8 + $0xf0] sm:$0xff] }
  0xf5   :  { %v1472_v8 = vpop.f32.mrf.mxu3 }
  0xf6   :  { %2032 = vmatpush.bf16.msrb.mxu3 %v3268_v51  ;;  %v1759_v5 = vmax.f32 %v1459_v3, 0.0  ;;  %2046 = vmatpush.bf16.msrb.mxu1 %v3276_v13  ;;  %v1473_v23 = vadd.f32 %v1472_v8, %v372_v16  ;;  %v3285_v51 = vld [vmem:[#allocation8 + $0x98] sm:$0xff] }
  0xf7   :  { %2070 = vmatpush.bf16.msrb.mxu0 %v3296_v11  ;;  %v3310_v11 = vld [vmem:[%s3572_s4] ss:$0 sm:$0xff] }
  0xf8   :  { %v1763_v6 = vpack.c.bf16 %v1759_v5, %v1755_v4  ;;  %2057 = vmatpush.bf16.msrb.mxu2 %v3287_v47  ;;  %v3295_v4 = vld [vmem:[#allocation8 + $0xe8] sm:$0xff] }
  0xf9   :  { %v1498_v14 = vpop.f32.mrf.mxu0 }
  0xfa   :  { %2033 = vmatpush.bf16.msrb.mxu3 %v3267_v56  ;;  %v1484_v10 = vpop.f32.mrf.mxu2  ;;  %2047 = vmatpush.bf16.msrb.mxu1 %v3275_v18  ;;  %v3283_v56 = vld [vmem:[#allocation8 + $0x88] sm:$0xff] }
  0xfb   :  { %v1485_v27 = vadd.f32 %v1484_v10, %v1471_v20  ;;  %2071 = vmatpush.bf16.msrb.mxu0 %v3295_v4 }
  0xfc   :  { %v1512_v19 = vpop.f32.mrf.mxu1  ;;  %2058 = vmatpush.bf16.msrb.mxu2 %v3286_v17 }
  0xfd   :  { %v1499_v29 = vadd.f32 %v1498_v14, %v1485_v27 }
  0xfe   :  { %2034 = vmatpush.bf16.msrb.mxu3 %v3266_v62  ;;  %2048 = vmatpush.bf16.msrb.mxu1 %v3274_v21 }
  0xff   :  { %v1513_v33 = vadd.f32 %v1512_v19, %v1499_v29  ;;  %v3292_v29 = vld [vmem:[#allocation8 + $0xd0] sm:$0xff] }
 0x100   :  { %v1526_v15 = vpop.f32.mrf.mxu3  ;;  %2059 = vmatpush.bf16.msrb.mxu2 %v3285_v51 }
 0x101   :  { %2035 = vmatmul.bf16.vlgmr.msrb.gmra.mxu3 %v1763_v6  ;;  %v1500_v26 = vpop.f32.mrf.mxu0  ;;  %v1527_v37 = vadd.f32 %v1526_v15, %v1513_v33  ;;  %v3291_v33 = vld [vmem:[#allocation8 + $0xc8] sm:$0xff] }
 0x102   :  { %v1486_v22 = vpop.f32.mrf.mxu2 }
 0x103   :  { %v1487_v28 = vadd.f32 %v1486_v22, %v1473_v23  ;;  %v3294_v22 = vld [vmem:[#allocation8 + $0xe0] sm:$0xff] }
 0x104   :  { %v1514_v32 = vpop.f32.mrf.mxu1  ;;  %2060 = vmatpush.bf16.msrb.mxu2 %v3284_v53  ;;  %2072 = vmatpush.bf16.msrb.mxu0 %v3294_v22 }
 0x105   :  { %v1501_v30 = vadd.f32 %v1500_v26, %v1487_v28  ;;  %v3293_v28 = vld [vmem:[#allocation8 + $0xd8] sm:$0xff] }
 0x107   :  { %v1515_v41 = vadd.f32 %v1514_v32, %v1501_v30 }
 0x108   :  { %v1528_v24 = vpop.f32.mrf.mxu3  ;;  %2061 = vmatpush.bf16.msrb.mxu2 %v3283_v56  ;;  %2073 = vmatpush.bf16.msrb.mxu0 %v3293_v28 }
 0x109   :  { %v1529_v38 = vadd.f32 %v1528_v24, %v1515_v41 }
 0x10c   :  { %2062 = vmatpush.bf16.msrb.mxu2 %v3282_v58  ;;  %2074 = vmatpush.bf16.msrb.mxu0 %v3292_v29 }
 0x110   :  { %v1554_v36 = vpop.f32.mrf.mxu3  ;;  %2075 = vmatpush.bf16.msrb.mxu0 %v3291_v33 }
 0x112   :  { %v1540_v31 = vpop.f32.mrf.mxu2 }
 0x113   :  { %v1541_v39 = vadd.f32 %v1540_v31, %v1527_v37  ;;  %v3290_v37 = vld [vmem:[#allocation8 + $0xc0] sm:$0xff] }
 0x114   :  { %2076 = vmatpush.bf16.msrb.mxu0 %v3290_v37 }
 0x115   :  { %v1555_v45 = vadd.f32 %v1554_v36, %v1541_v39  ;;  %v374_v36 = vperm.slane %v3540_v25, 3 }
 0x117   :  { %v1756_v48 = vmax.f32 %v1555_v45, 0.0 }
 0x118   :  { %v1556_v40 = vpop.f32.mrf.mxu3 }
 0x119   :  { %v1596_v54 = vpop.f32.mrf.mxu0 }
 0x11a   :  { %v1542_v42 = vpop.f32.mrf.mxu2  ;;  %v1568_v52 = vpop.f32.mrf.mxu1 }
 0x11b   :  { %v1543_v44 = vadd.f32 %v1542_v42, %v1529_v38  ;;  %v1569_v59 = vadd.f32 %v1568_v52, %v373_v57 }
 0x11d   :  { %v1557_v46 = vadd.f32 %v1556_v40, %v1543_v44 }
 0x11f   :  { %v1760_v49 = vmax.f32 %v1557_v46, 0.0 }
 0x121   :  { %v1764_v50 = vpack.c.bf16 %v1760_v49, %v1756_v48  ;;  %v1598_v61 = vpop.f32.mrf.mxu0 }
 0x122   :  { %v1570_v12 = vpop.f32.mrf.mxu1 }
 0x123   :  { %2049 = vmatmul.bf16.vlgmr.msrb.gmra.mxu1 %v1764_v50  ;;  %v1571_v0 = vadd.f32 %v1570_v12, %v373_v57 }
 0x124   :  { %v1582_v55 = vpop.f32.mrf.mxu3 }
 0x125   :  { %v1583_v63 = vadd.f32 %v1582_v55, %v1569_v59 }
 0x127   :  { %v1597_v2 = vadd.f32 %v1596_v54, %v1583_v63 }
 0x129   :  { %v1652_v5 = vpop.f32.mrf.mxu0 }
 0x12c   :  { %v1584_v35 = vpop.f32.mrf.mxu3 }
 0x12d   :  { %v1585_v3 = vadd.f32 %v1584_v35, %v1571_v0 }
 0x12f   :  { %v1599_v8 = vadd.f32 %v1598_v61, %v1585_v3 }
 0x131   :  { %v1654_v20 = vpop.f32.mrf.mxu0 }
 0x132   :  { %v1610_v62 = vpop.f32.mrf.mxu2 }
 0x133   :  { %v1611_v7 = vadd.f32 %v1610_v62, %v1597_v2 }
 0x13a   :  { %v1624_v1 = vpop.f32.mrf.mxu1  ;;  %v1612_v9 = vpop.f32.mrf.mxu2 }
 0x13b   :  { %v1625_v10 = vadd.f32 %v1624_v1, %v1611_v7  ;;  %v1613_v14 = vadd.f32 %v1612_v9, %v1599_v8 }
 0x13d   :  { %v1680_v30 = vpop.f32.mrf.mxu0 }
 0x142   :  { %v1626_v13 = vpop.f32.mrf.mxu1 }
 0x143   :  { %v1627_v16 = vadd.f32 %v1626_v13, %v1613_v14 }
 0x144   :  { %v1638_v6 = vpop.f32.mrf.mxu3 }
 0x145   :  { %v1639_v15 = vadd.f32 %v1638_v6, %v1625_v10  ;;  %v1682_v38 = vpop.f32.mrf.mxu0 }
 0x147   :  { %v1653_v19 = vadd.f32 %v1652_v5, %v1639_v15 }
 0x149   :  { %v1757_v24 = vmax.f32 %v1653_v19, 0.0 }
 0x14c   :  { %v1640_v18 = vpop.f32.mrf.mxu3 }
 0x14d   :  { %v1641_v21 = vadd.f32 %v1640_v18, %v1627_v16 }
 0x14f   :  { %v1655_v23 = vadd.f32 %v1654_v20, %v1641_v21 }
 0x151   :  { %v1761_v27 = vmax.f32 %v1655_v23, 0.0 }
 0x152   :  { %v1666_v32 = vpop.f32.mrf.mxu2 }
 0x153   :  { %v1765_v26 = vpack.c.bf16 %v1761_v27, %v1757_v24  ;;  %v1667_v41 = vadd.f32 %v1666_v32, %v374_v36 }
 0x155   :  { %2063 = vmatmul.bf16.vlgmr.msrb.gmra.mxu2 %v1765_v26  ;;  %v1681_v43 = vadd.f32 %v1680_v30, %v1667_v41 }
 0x15a   :  { %v1694_v31 = vpop.f32.mrf.mxu1  ;;  %v1668_v39 = vpop.f32.mrf.mxu2 }
 0x15b   :  { %v1669_v44 = vadd.f32 %v1668_v39, %v374_v36  ;;  %v1695_v45 = vadd.f32 %v1694_v31, %v1681_v43 }
 0x15d   :  { %v1736_v40 = vpop.f32.mrf.mxu0  ;;  %v1683_v49 = vadd.f32 %v1682_v38, %v1669_v44 }
 0x162   :  { %v1696_v34 = vpop.f32.mrf.mxu1 }
 0x163   :  { %v1697_v17 = vadd.f32 %v1696_v34, %v1683_v49 }
 0x164   :  { %v1708_v42 = vpop.f32.mrf.mxu3 }
 0x165   :  { %v1709_v46 = vadd.f32 %v1708_v42, %v1695_v45  ;;  %v1738_v55 = vpop.f32.mrf.mxu0 }
 0x16a   :  { %v1750_v48 = vpop.f32.mrf.mxu1 }
 0x16c   :  { %v1710_v50 = vpop.f32.mrf.mxu3 }
 0x16d   :  { %v1711_v25 = vadd.f32 %v1710_v50, %v1697_v17 }
 0x172   :  { %v1722_v47 = vpop.f32.mrf.mxu2  ;;  %v1752_v56 = vpop.f32.mrf.mxu1 }
 0x173   :  { %v1723_v51 = vadd.f32 %v1722_v47, %v1709_v46 }
 0x175   :  { %v1737_v52 = vadd.f32 %v1736_v40, %v1723_v51 }
 0x177   :  { %v1751_v57 = vadd.f32 %v1750_v48, %v1737_v52 }
 0x179   :  { %v1758_v59 = vmax.f32 %v1751_v57, 0.0 }
 0x17a   :  { %v1724_v53 = vpop.f32.mrf.mxu2 }
 0x17b   :  { %v1725_v54 = vadd.f32 %v1724_v53, %v1711_v25 }
 0x17d   :  { %v1739_v58 = vadd.f32 %v1738_v55, %v1725_v54 }
 0x17f   :  { %v1753_v12 = vadd.f32 %v1752_v56, %v1739_v58 }
 0x181   :  { %v1762_v60 = vmax.f32 %v1753_v12, 0.0 }
 0x183   :  { %v1766_v61 = vpack.c.bf16 %v1762_v60, %v1758_v59 }
 0x184   :  { %v2036_v62 = vpop.f32.mrf.mxu3 }
 0x185   :  { %2077 = vmatmul.bf16.vlgmr.msrb.gmra.mxu0 %v1766_v61  ;;  %v2037_v0 = vadd.f32 %v3310_v11, %v2036_v62 }
 0x18c   :  { %v2038_v2 = vpop.f32.mrf.mxu3 }
 0x18d   :  { %v2039_v6 = vadd.f32 %v3310_v11, %v2038_v2 }
 0x1a0   :  { %v2050_v35 = vpop.f32.mrf.mxu1 }
 0x1a1   :  { %v2051_v1 = vadd.f32 %v2050_v35, %v2037_v0 }
 0x1a8   :  { %v2052_v4 = vpop.f32.mrf.mxu1 }
 0x1a9   :  { %v2053_v8 = vadd.f32 %v2052_v4, %v2039_v6 }
 0x1d8   :  { %v2064_v63 = vpop.f32.mrf.mxu2 }
 0x1d9   :  { %v2065_v3 = vadd.f32 %v2064_v63, %v2051_v1 }
 0x1e0   :  { %v2066_v9 = vpop.f32.mrf.mxu2 }
 0x1e1   :  { %v2067_v14 = vadd.f32 %v2066_v9, %v2053_v8 }
 0x202   :  { %v2078_v5 = vpop.f32.mrf.mxu0 }
 0x203   :  { %v2079_v7 = vadd.f32 %v2078_v5, %v2065_v3 }
 0x205   :  { %v2083_v10 = vpack.c.bf16 %v2079_v7, %v2079_v7 }
 0x207   :  { %v2087_v13 = vrot.slane %v2083_v10, 3 }
 0x209   :  { %v2092_v15 = vsel %vm2089_vm1, %v2083_v10, %v2087_v13  ;;  %v2094_v16 = vsel %vm2093_vm2, %v2083_v10, %v2087_v13  ;;  %v2098_v18 = vsel %vm2097_vm3, %v2083_v10, %v2087_v13  ;;  %v2102_v19 = vsel %vm2101_vm4, %v2083_v10, %v2087_v13 }
 0x20a   :  { %v2096_v20 = vrot.slane %v2094_v16, 1  ;;  %v2100_v21 = vrot.slane %v2098_v18, 2  ;;  %v2104_v22 = vrot.slane %v2102_v19, 3  ;;  %2125 = vst [vmem:[#allocation10] sm:$0x1] %v2092_v15  ;;  %v2080_v23 = vpop.f32.mrf.mxu0 }
 0x20b   :  { %v2081_v24 = vadd.f32 %v2080_v23, %v2067_v14 }
 0x20c   :  { %2126 = vst [vmem:[#allocation10 + $0x1] sm:$0x1] %v2096_v20 }
 0x20d   :  { %2127 = vst [vmem:[#allocation10 + $0x2] sm:$0x1] %v2100_v21  ;;  %v2084_v27 = vpack.c.bf16 %v2081_v24, %v2081_v24 }
 0x20e   :  { %2128 = vst [vmem:[#allocation10 + $0x3] sm:$0x1] %v2104_v22 }
 0x20f   :  { %v2088_v26 = vrot.slane %v2084_v27, 3 }
 0x211   :  { %v2107_v28 = vsel %vm2089_vm1, %v2084_v27, %v2088_v26  ;;  %v2108_v29 = vsel %vm2093_vm2, %v2084_v27, %v2088_v26  ;;  %v2111_v30 = vsel %vm2097_vm3, %v2084_v27, %v2088_v26  ;;  %v2114_v31 = vsel %vm2101_vm4, %v2084_v27, %v2088_v26 }
 0x212   :  { %v2110_v32 = vrot.slane %v2108_v29, 1  ;;  %v2113_v33 = vrot.slane %v2111_v30, 2  ;;  %v2116_v36 = vrot.slane %v2114_v31, 3  ;;  %2129 = vst [vmem:[#allocation10 + $0x4] sm:$0x1] %v2107_v28 }
 0x214   :  { %2130 = vst [vmem:[#allocation10 + $0x5] sm:$0x1] %v2110_v32 }
 0x215   :  { %2131 = vst [vmem:[#allocation10 + $0x6] sm:$0x1] %v2113_v33 }
 0x216   :  { %2132 = vst [vmem:[#allocation10 + $0x7] sm:$0x1] %v2116_v36 }
 0x217   :  { %2136 = vsyncadd [#allocation4], 112  ;;  %s2139_s18 = sshll.u32 %s3573_s5, 4  ;;  %s3449_s19 = smov [#allocation10]   ;;  %s2140_s18 = int_to_ptr.hbm [resolvable:$true] %s2139_s18 }
 0x218   :  { %s2137_s20 = sshll.u32 %s3449_s19, 4  ;;  %s3450_s21 = smov 1   ;;  %s2138_s20 = int_to_ptr.vmem [resolvable:$true] %s2137_s20 }
 0x219   :  { %2145 = dma.vmem_to_hbm [thread:$0]  %s2138_s20, 16, %s2140_s18, [#allocation4], %s3441_s27, %s3441_s27, %s3450_s21  }
 0x21a   :  { %3437 = dma.done.wait [#allocation4], 128  }
 0x21b   :  { %3438 = vsyncadd [#allocation4], 4294967168 }
 0x21c   :  { %2150 = vsyncpa [#allocation3], 1 }
 0x21d   :  { %2151 = vsyncpa [#allocation6], 1 }
 0x21e   :  { %2152 = vsyncpa [#allocation9], 1 }
 0x21f   :  { %2153 = vsyncpa [#allocation4], 1 }

</bundles_post_ra>
